<compile_context>
chip_gen: v7x
topology: tpu7x:2x2x1
jax: 0.10.0
libtpu: 0.0.40
codegen_flags: <defaults>
</compile_context>

<pallas_src>
import math

import numpy as np
import jax
import jax.numpy as jnp
from jax.experimental import pallas as pl
from jax.experimental.pallas import tpu as pltpu


def _pe_kernel(t_ref, dscale_ref, phase_ref, x_ref, o_ref):
    # t_ref:      (1, 128, TBr)  time of flat row j*128 + k at [0, k, j]
    # dscale_ref: (1, D)         scale * div_term[c // 2]
    # phase_ref:  (1, D)         0 for even c, pi/2 for odd c (cos(z) = sin(z + pi/2))
    # x_ref/o_ref:(TB, D)        TB = 128 * TBr rows of the flattened (N, D) input
    dscale = dscale_ref[...]
    phase = phase_ref[...]
    tcols = t_ref[0]                               # (128, TBr), times along sublanes
    n_chunks = tcols.shape[1]
    for j in range(n_chunks):                      # static unroll, TBr <= 32
        col = tcols[:, j:j + 1]                    # (128, 1) column of times
        pe = jnp.sin(col * dscale + phase)         # (128, D) via lane broadcast + one sin
        rows = pl.ds(j * 128, 128)
        o_ref[rows, :] = (x_ref[rows, :] + pe).astype(o_ref.dtype)


def _vmem_capacity_bytes() -> int:
    try:
        return int(pltpu.get_tpu_info().vmem_capacity_bytes)
    except Exception:
        return 64 * 1024 * 1024        # unknown -> assume the smallest (v7x-like) budget


def _row_block(n_rows: int, d: int, itemsize: int, *,
               target_bytes: int, min_steps: int, max_rows: int = 4096) -> int:
    """Row-block size: multiple of 128 (keeps 128-row chunks + sublane tiles for any dtype)."""
    rows_pad = -(-n_rows // 128) * 128
    bytes_per_row = max(1, d * itemsize)
    tb = (target_bytes // bytes_per_row) // 128 * 128
    tb = max(128, min(tb, max_rows))               # cap TBr (<=32) -> bounded unroll
    if min_steps > 1:
        rows_per_step = -(-n_rows // min_steps)
        cap = max(128, -(-rows_per_step // 128) * 128)
        tb = min(tb, cap)                          # keep a few steps for pipelining / 2 TCs
    return min(tb, rows_pad)


def continuous_sincos_pos_enc(x, t, *, max_tokens, max_time, donate_x=False):
    """x: (S, M, D), t: (S, M, 1) -> x + pe  (matches the PyTorch module in eval mode)."""
    S, M, D = x.shape
    assert D % 2 == 0, "d_model must be even."
    N = S * M

    # ---- host-side per-channel constants (never recomputed inside the kernel) ----
    c = np.arange(D)
    div_c = np.exp((c - (c % 2)) * (-math.log(max_tokens) / D))           # div_term[c // 2]
    scale = (max_tokens - 1) / max_time
    dscale = jnp.asarray((scale * div_c).astype(np.float32)).reshape(1, D)
    phase = jnp.asarray(np.where(c % 2 == 0, 0.0, np.pi / 2.0)
                        .astype(np.float32)).reshape(1, D)

    # ---- generation-aware tile / VMEM budget ----
    if _vmem_capacity_bytes() >= 100 * 1024 * 1024:          # v5e / v6e (128 MiB VMEM, 1 TC)
        target_bytes, vmem_limit, min_steps = 6 * 1024 * 1024, 64 * 1024 * 1024, 2
    else:                                                    # v7x (64 MiB, 2 TCs) or unknown
        target_bytes, vmem_limit, min_steps = 5 * 512 * 1024, 48 * 1024 * 1024, 4

    TB = _row_block(N, D, x.dtype.itemsize,
                    target_bytes=target_bytes, min_steps=min_steps)
    NB = -(-N // TB)
    TBr = TB // 128

    # ---- x: collapse leading dims only (minor dim D untouched -> no (8,128) relayout).
    # Note: if M is not a multiple of the sublane tile, XLA may still insert a layout
    # copy for this collapse; callers with such shapes should pass pre-flattened data.
    x2 = x.reshape(N, D)
    n_rows = N
    if N < 128:                        # tiny-problem guard: never make a block larger than x
        x2 = jnp.pad(x2, ((0, 128 - N), (0, 0)))
        n_rows = 128

    # ---- t side-band: lane+sublane dense (NB, 128, TBr), zero-padded to NB*TB tokens ----
    t_flat = jnp.reshape(t, (-1,)).astype(jnp.float32)
    t_flat = jnp.pad(t_flat, (0, NB * TB - N))
    t_side = t_flat.reshape(NB, TBr, 128).transpose(0, 2, 1)   # [b, k, j] = t[b*TB + j*128 + k]

    row_spec = pl.BlockSpec((TB, D), lambda i: (i, 0))
    out2 = pl.pallas_call(
        _pe_kernel,
        out_shape=jax.ShapeDtypeStruct((n_rows, D), x.dtype),
        grid=(NB,),
        in_specs=[
            pl.BlockSpec((1, 128, TBr), lambda i: (i, 0, 0)),   # t side-band (dense)
            pl.BlockSpec((1, D), lambda i: (0, 0)),             # dscale (resident)
            pl.BlockSpec((1, D), lambda i: (0, 0)),             # phase  (resident)
            row_spec,                                           # x
        ],
        out_specs=row_spec,
        input_output_aliases=({3: 0} if donate_x else {}),
        compiler_params=pltpu.CompilerParams(
            dimension_semantics=("parallel",),
            vmem_limit_bytes=vmem_limit,
        ),
    )(t_side, dscale, phase, x2)

    if n_rows != N:
        out2 = out2[:N]
    return out2.reshape(S, M, D)


def _reference(x, t, *, max_tokens, max_time):
    D = x.shape[-1]
    position = t / max_time * (max_tokens - 1)                            # (S, M, 1)
    div_term = jnp.exp(jnp.arange(0, D, 2, dtype=jnp.float32)
                       * jnp.float32(-math.log(max_tokens) / D))          # (D/2,)
    pe = jnp.zeros(x.shape, dtype=jnp.float32)
    pe = pe.at[..., 0::2].set(jnp.sin(position * div_term))
    pe = pe.at[..., 1::2].set(jnp.cos(position * div_term))
    return x + pe


def _run_case(key, S, M, D, max_tokens, max_time):
    kx, kt = jax.random.split(key)
    x = jax.random.normal(kx, (S, M, D), dtype=jnp.float32)
    t = jax.random.uniform(kt, (S, M, 1), dtype=jnp.float32,
                           minval=0.0, maxval=max_time)
    out = continuous_sincos_pos_enc(x, t, max_tokens=max_tokens, max_time=max_time)
    out = jax.block_until_ready(out)
    ref = _reference(x, t, max_tokens=max_tokens, max_time=max_time)
    assert out.shape == (S, M, D)
    err = float(jnp.max(jnp.abs(out - ref)))
    assert jnp.allclose(out, ref, atol=5e-5, rtol=1e-5), f"mismatch vs reference: {err}"


if __name__ == "__main__":
    key = jax.random.PRNGKey(0)
    k1, k2, k3, k4 = jax.random.split(key, 4)
    # D < 128, N = 128 -> exactly one full row block
    _run_case(k1, S=16, M=8, D=32, max_tokens=64, max_time=10.0)
    # N = 32 < 128 -> tiny-problem padded path, M not a multiple of 8
    _run_case(k2, S=8, M=4, D=128, max_tokens=64, max_time=10.0)
    # odd token count, lane-sparse D
    _run_case(k3, S=10, M=4, D=32, max_tokens=64, max_time=10.0)
    # multi-block grid with multiple 128-row chunks per block (TBr > 1)
    _run_case(k4, S=64, M=16, D=256, max_tokens=128, max_time=5.0)
    print("KERNEL_OK")
</pallas_src>

<mosaic_0001>
module attributes {stable_mosaic.version = 11 : i64} {
  func.func @_pe_kernel(%arg0: i32, %arg1: memref<1x128x1xf32, #tpu.memory_space<vmem>>, %arg2: memref<1x32xf32, #tpu.memory_space<vmem>>, %arg3: memref<1x32xf32, #tpu.memory_space<vmem>>, %arg4: memref<128x32xf32, #tpu.memory_space<vmem>>, %arg5: memref<128x32xf32, #tpu.memory_space<vmem>>) attributes {dimension_semantics = [#tpu.dimension_semantics<parallel>], iteration_bounds = array<i64: 1>, scalar_prefetch = 0 : i64, scratch_operands = 0 : i64, tpu.core_type = #tpu.core_type<tc>, window_params = [{transform_indices = @transform_0, window_bounds = array<i64: 1, 128, 1>}, {pipeline_mode = #tpu.pipeline_mode<synchronous>, transform_indices = @transform_1, window_bounds = array<i64: 1, 32>}, {pipeline_mode = #tpu.pipeline_mode<synchronous>, transform_indices = @transform_2, window_bounds = array<i64: 1, 32>}, {transform_indices = @transform_3, window_bounds = array<i64: 128, 32>}, {transform_indices = @transform_4, window_bounds = array<i64: 128, 32>}]} {
    %c0 = arith.constant 0 : index
    %c0_0 = arith.constant 0 : index
    %0 = vector.load %arg2[%c0, %c0_0] : memref<1x32xf32, #tpu.memory_space<vmem>>, vector<1x32xf32>
    %c0_1 = arith.constant 0 : index
    %c0_2 = arith.constant 0 : index
    %1 = vector.load %arg3[%c0_1, %c0_2] : memref<1x32xf32, #tpu.memory_space<vmem>>, vector<1x32xf32>
    %c0_3 = arith.constant 0 : index
    %c0_4 = arith.constant 0 : index
    %c0_5 = arith.constant 0 : index
    %2 = vector.load %arg1[%c0_3, %c0_4, %c0_5] : memref<1x128x1xf32, #tpu.memory_space<vmem>>, vector<1x128x1xf32>
    %3 = vector.shape_cast %2 : vector<1x128x1xf32> to vector<128x1xf32>
    %4 = vector.broadcast %3 : vector<128x1xf32> to vector<128x32xf32>
    %5 = vector.broadcast %0 : vector<1x32xf32> to vector<128x32xf32>
    %6 = arith.mulf %4, %5 : vector<128x32xf32>
    %7 = vector.broadcast %1 : vector<1x32xf32> to vector<128x32xf32>
    %8 = arith.addf %6, %7 : vector<128x32xf32>
    %9 = math.sin %8 : vector<128x32xf32>
    %c0_6 = arith.constant 0 : index
    %c0_7 = arith.constant 0 : index
    %10 = vector.load %arg4[%c0_6, %c0_7] : memref<128x32xf32, #tpu.memory_space<vmem>>, vector<128x32xf32>
    %11 = arith.addf %10, %9 : vector<128x32xf32>
    %c0_8 = arith.constant 0 : index
    %c0_9 = arith.constant 0 : index
    %12 = vector.load %arg5[%c0_8, %c0_9] : memref<128x32xf32, #tpu.memory_space<vmem>>, vector<128x32xf32>
    tpu.vector_store %arg5[%c0_8, %c0_9], %11 {strides = array<i32>} : memref<128x32xf32, #tpu.memory_space<vmem>>, vector<128x32xf32>,
    return
  }
  func.func @transform_0(%arg0: i32) -> (i32, i32, i32) {
    %c0_i32 = arith.constant 0 : i32
    %c0_i32_0 = arith.constant 0 : i32
    %c0_i32_1 = arith.constant 0 : i32
    return %arg0, %c0_i32, %c0_i32_0 : i32, i32, i32
  }
  func.func @transform_1(%arg0: i32) -> (i32, i32) {
    %c0_i32 = arith.constant 0 : i32
    %c0_i32_0 = arith.constant 0 : i32
    %c0_i32_1 = arith.constant 0 : i32
    return %c0_i32, %c0_i32_0 : i32, i32
  }
  func.func @transform_2(%arg0: i32) -> (i32, i32) {
    %c0_i32 = arith.constant 0 : i32
    %c0_i32_0 = arith.constant 0 : i32
    %c0_i32_1 = arith.constant 0 : i32
    return %c0_i32, %c0_i32_0 : i32, i32
  }
  func.func @transform_3(%arg0: i32) -> (i32, i32) {
    %c0_i32 = arith.constant 0 : i32
    %c0_i32_0 = arith.constant 0 : i32
    return %arg0, %c0_i32 : i32, i32
  }
  func.func @transform_4(%arg0: i32) -> (i32, i32) {
    %c0_i32 = arith.constant 0 : i32
    %c0_i32_0 = arith.constant 0 : i32
    return %arg0, %c0_i32 : i32, i32
  }
}

</mosaic_0001>

<bundles_post_ra>
// kernel: tpu_custom_call.1
= control target key start
LH: loop header
LB: loop body
LE: loop exit
PB: predicated region body
PF: predicated region fallthrough
CT: control target
= control target key end

     0   :  { %v2083_v0 = vmov 0   ;;  %v2084_v55 = vmov 683565275   ;;  %v2085_v59 = vmov 2475754826   ;;  %s3543_s0 = inlined_call_operand.vmem [shape: f32[1,128,1], index: 0, kind: input, shape index: {}]   ;;  %s3544_s1 = inlined_call_operand.vmem [shape: f32[1,32], index: 1, kind: input, shape index: {}]   ;;  %s3545_s2 = inlined_call_operand.vmem [shape: f32[1,32], index: 2, kind: input, shape index: {}]   ;;  %s3546_s3 = inlined_call_operand.vmem [shape: f32[128,32], index: 3, kind: input, shape index: {}]   ;;  %s3547_s4 = inlined_call_operand.vmem [shape: f32[128,32], index: 4, kind: output, shape index: {}]  }
   0x1   :  { %2014 = vset.pattern.permute.xlu1 %v2083_v0  ;;  %2013 = vset.pattern.permute.xlu0 %v2083_v0  ;;  %v21_v1 = vld [vmem:[%s3543_s0 + $0x10] sm:$0xff]  ;;  %v19_v2 = vld [vmem:[%s3543_s0] sm:$0xff]  ;;  %v22_v3 = vld [vmem:[%s3543_s0 + $0x18] sm:$0xff]  ;;  %v2086_v61 = vmov 2131351028  }
   0x2   :  { %47 = vperm.xlu1 %2014, %v21_v1   ;;  %37 = vperm.xlu0 %2013, %v19_v2   ;;  %v20_v4 = vld [vmem:[%s3543_s0 + $0x8] sm:$0xff]  ;;  %v23_v6 = vld [vmem:[%s3543_s0 + $0x20] sm:$0xff]  ;;  %v26_v7 = vld [vmem:[%s3543_s0 + $0x38] sm:$0xff]  ;;  %v2087_v63 = vmov 2102212464  }
   0x3   :  { %v24_v5 = vld [vmem:[%s3543_s0 + $0x28] sm:$0xff]  ;;  %v25_v8 = vld [vmem:[%s3543_s0 + $0x30] sm:$0xff]  ;;  %v27_v10 = vld [vmem:[%s3543_s0 + $0x40] sm:$0xff]  ;;  %v2088_v1 = vmov 920167782  }
   0x4   :  { %v28_v9 = vld [vmem:[%s3543_s0 + $0x48] sm:$0xff]  ;;  %v30_v11 = vld [vmem:[%s3543_s0 + $0x58] sm:$0xff]  ;;  %v29_v12 = vld [vmem:[%s3543_s0 + $0x50] sm:$0xff] }
   0x5   :  { %v32_v13 = vld [vmem:[%s3543_s0 + $0x68] sm:$0xff]  ;;  %v31_v14 = vld [vmem:[%s3543_s0 + $0x60] sm:$0xff]  ;;  %v34_v15 = vld [vmem:[%s3543_s0 + $0x78] sm:$0xff] }
   0x6   :  { %52 = vperm.xlu1 %2014, %v22_v3   ;;  %42 = vperm.xlu0 %2013, %v20_v4   ;;  %v33_v16 = vld [vmem:[%s3543_s0 + $0x70] sm:$0xff]  ;;  %v2166_v17 = vld [vmem:[%s3544_s1] ss:$0 sm:$0xff] }
   0x7   :  { %v2171_v18 = vld [vmem:[%s3545_s2] ss:$0 sm:$0xff] }
   0xa   :  { %62 = vperm.xlu1 %2014, %v24_v5   ;;  %57 = vperm.xlu0 %2013, %v23_v6  }
   0xe   :  { %72 = vperm.xlu1 %2014, %v26_v7   ;;  %67 = vperm.xlu0 %2013, %v25_v8   ;;  %v2089_v8 = vmov 1326507024  }
  0x12   :  { %82 = vperm.xlu1 %2014, %v28_v9   ;;  %77 = vperm.xlu0 %2013, %v27_v10  }
  0x16   :  { %92 = vperm.xlu1 %2014, %v30_v11   ;;  %87 = vperm.xlu0 %2013, %v29_v12  }
  0x1a   :  { %102 = vperm.xlu1 %2014, %v32_v13   ;;  %97 = vperm.xlu0 %2013, %v31_v14  }
  0x1e   :  { %112 = vperm.xlu1 %2014, %v34_v15   ;;  %107 = vperm.xlu0 %2013, %v33_v16  }
  0x81   :  { %v48_v19 = vpop.permute.xlu1 %47  ;;  %v38_v20 = vpop.permute.xlu0 %37 }
  0x82   :  { %v123_v21 = vmul.f32 %v2166_v17, %v48_v19  ;;  %v121_v22 = vmul.f32 %v2166_v17, %v38_v20 }
  0x84   :  { %v2176_v23 = vadd.f32 %v2171_v18, %v123_v21  ;;  %v2179_v24 = vadd.f32 %v2171_v18, %v121_v22 }
  0x85   :  { %v53_v25 = vpop.permute.xlu1 %52  ;;  %v43_v43 = vpop.permute.xlu0 %42 }
  0x86   :  { %v367_v26 = vand.u32 2147483647, %v2176_v23  ;;  %v370_v27 = vand.u32 2139095040, %v2176_v23  ;;  %v159_v28 = vand.u32 2147483647, %v2179_v24  ;;  %v162_v29 = vand.u32 2139095040, %v2179_v24 }
  0x87   :  { %v124_v31 = vmul.f32 %v2166_v17, %v53_v25  ;;  %v2195_v49 = vmul.f32 %v2166_v17, %v43_v43  ;;  %vm369_vm13 = vcmp.lt.s32.totalorder %v2176_v23, 0  ;;  %vm161_vm15 = vcmp.lt.s32.totalorder %v2179_v24, 0 }
  0x88   :  { %v371_v30 = vshrl.u32 %v370_v27, 23  ;;  %v374_v32 = vand.u32 8388607, %v367_v26  ;;  %v163_v33 = vshrl.u32 %v162_v29, 23  ;;  %v166_v34 = vand.u32 8388607, %v159_v28 }
  0x89   :  { %v2191_v36 = vadd.f32 %v2171_v18, %v124_v31  ;;  %vm2282_vm14 = vcmp.le.f32.partialorder %v367_v26, 0.7853982 }
  0x8a   :  { %v1886_v35 = vadd.s32 4294967169, %v371_v30  ;;  %v1878_v37 = vadd.s32 4294967169, %v163_v33  ;;  %v375_v39 = vor.u32 8388608, %v374_v32  ;;  %v167_v40 = vor.u32 8388608, %v166_v34 }
  0x8b   :  { %v474_v42 = vand.u32 2139095040, %v2191_v36  ;;  %v471_v53 = vand.u32 2147483647, %v2191_v36 }
  0x8c   :  { %v377_v38 = vadd.s32 1, %v1886_v35  ;;  %v169_v41 = vadd.s32 1, %v1878_v37  ;;  %v2197_v50 = vshll.u32 %v375_v39, 8  ;;  %v2201_v52 = vshll.u32 %v167_v40, 8 }
  0x8d   :  { %v475_v45 = vshrl.u32 %v474_v42, 23 }
  0x8e   :  { %vm378_vm0 = vcmp.gt.s32.totalorder %v377_v38, 0  ;;  %vm170_vm1 = vcmp.gt.s32.totalorder %v169_v41, 0 }
  0x8f   :  { %v379_v44 = vsel %vm378_vm0, %v377_v38, 0  ;;  %v171_v48 = vsel %vm170_vm1, %v169_v41, 0  ;;  %v2205_v58 = vadd.s32 4294967169, %v475_v45 }
  0x90   :  { %v380_v46 = vshrl.u32 %v379_v44, 5  ;;  %v381_v47 = vand.u32 31, %v379_v44  ;;  %v2199_v51 = vshrl.u32 %v171_v48, 5  ;;  %v173_v57 = vand.u32 31, %v171_v48 }
  0x92   :  { %v382_v54 = vsub.s32 32, %v381_v47  ;;  %v384_v56 = vshll.u32 %v2084_v55, %v381_v47  ;;  %v387_v60 = vshll.u32 %v2085_v59, %v381_v47  ;;  %v390_v62 = vshll.u32 %v2086_v61, %v381_v47 }
  0x93   :  { %v393_v0 = vshll.u32 %v2087_v63, %v381_v47  ;;  %v396_v2 = vshll.u32 %v2088_v1, %v381_v47  ;;  %vm399_vm2 = vcmp.lt.s32.totalorder %v380_v46, 1  ;;  %vm400_vm3 = vcmp.lt.s32.totalorder %v380_v46, 2 }
  0x94   :  { %v385_v3 = vshrl.u32 %v2085_v59, %v382_v54  ;;  %v388_v4 = vshrl.u32 %v2086_v61, %v382_v54  ;;  %v391_v5 = vshrl.u32 %v2087_v63, %v382_v54  ;;  %v383_v6 = vshrl.u32 %v2084_v55, %v382_v54 }
  0x95   :  { %v394_v7 = vshrl.u32 %v2088_v1, %v382_v54  ;;  %v397_v9 = vshrl.u32 %v2089_v8, %v382_v54  ;;  %v174_v13 = vsub.s32 32, %v173_v57  ;;  %vm401_vm4 = vcmp.lt.s32.totalorder %v380_v46, 3 }
  0x96   :  { %v386_v10 = vor.u32 %v385_v3, %v384_v56  ;;  %v389_v11 = vor.u32 %v388_v4, %v387_v60  ;;  %v392_v12 = vor.u32 %v391_v5, %v390_v62  ;;  %vm402_vm5 = vcmp.lt.s32.totalorder %v380_v46, 4 }
  0x97   :  { %v395_v14 = vor.u32 %v394_v7, %v393_v0  ;;  %v398_v15 = vor.u32 %v397_v9, %v396_v2  ;;  %v176_v29 = vshll.u32 %v2084_v55, %v173_v57  ;;  %v177_v32 = vshrl.u32 %v2085_v59, %v174_v13 }
  0x98   :  { %v403_v16 = vsel %vm399_vm2, %v383_v6, %v386_v10  ;;  %v404_v19 = vsel %vm402_vm5, %v392_v12, 2102212464  ;;  %v407_v20 = vsel %vm399_vm2, %v386_v10, %v389_v11  ;;  %v411_v21 = vsel %vm399_vm2, %v389_v11, %v392_v12 }
  0x99   :  { %v405_v22 = vsel %vm401_vm4, %v389_v11, %v404_v19  ;;  %v408_v25 = vsel %vm402_vm5, %v395_v14, 920167782  ;;  %v412_v27 = vsel %vm402_vm5, %v398_v15, 1326507024  ;;  %v179_v33 = vshll.u32 %v2085_v59, %v173_v57 }
  0x9a   :  { %v409_v30 = vsel %vm401_vm4, %v392_v12, %v408_v25  ;;  %v413_v31 = vsel %vm401_vm4, %v395_v14, %v412_v27  ;;  %v406_v34 = vsel %vm400_vm3, %v403_v16, %v405_v22  ;;  %v180_v38 = vshrl.u32 %v2086_v61, %v174_v13 }
  0x9b   :  { %v410_v35 = vsel %vm400_vm3, %v407_v20, %v409_v30  ;;  %v414_v37 = vsel %vm400_vm3, %v411_v21, %v413_v31  ;;  %v178_v43 = vor.u32 %v177_v32, %v176_v29  ;;  %v182_v45 = vshll.u32 %v2086_v61, %v173_v57 }
  0x9c   :  { %v2228_v39 = vmul.u32.u64.low %v2197_v50, %v414_v37  ;;  %v2229_v40 = vmul.u32.u64.high %v2197_v50, %v414_v37, %v2228_v39  ;;  %v2232_v41 = vmul.u32.u64.low %v2197_v50, %v410_v35  ;;  %v2233_v42 = vmul.u32.u64.high %v2197_v50, %v410_v35, %v2232_v41 }
  0x9d   :  { %v181_v44 = vor.u32 %v180_v38, %v179_v33  ;;  %v183_v47 = vshrl.u32 %v2087_v63, %v174_v13  ;;  %v175_v48 = vshrl.u32 %v2084_v55, %v174_v13  ;;  %v185_v46 = vshll.u32 %v2087_v63, %v173_v57 }
  0x9e   :  { %v186_v54 = vshrl.u32 %v2088_v1, %v174_v13  ;;  %v189_v56 = vshrl.u32 %v2089_v8, %v174_v13  ;;  %v422_v60 = vmul.u32 %v2197_v50, %v406_v34  ;;  %v188_v0 = vshll.u32 %v2088_v1, %v173_v57 }
  0x9f   :  { %v184_v62 = vor.u32 %v183_v47, %v182_v45  ;;  %vm191_vm6 = vcmp.lt.s32.totalorder %v2199_v51, 1  ;;  %vm424_vm7 = vc.u32 %v2229_v40, %v2232_v41  ;;  %v425_v2 = vadd.s32 1, %v2233_v42 }
  0xa0   :  { %v187_v3 = vor.u32 %v186_v54, %v185_v46  ;;  %vm192_vm8 = vcmp.lt.s32.totalorder %v2199_v51, 2  ;;  %v190_v4 = vor.u32 %v189_v56, %v188_v0  ;;  %vm193_vm9 = vcmp.lt.s32.totalorder %v2199_v51, 3 }
  0xa1   :  { %vm194_vm10 = vcmp.lt.s32.totalorder %v2199_v51, 4  ;;  %v199_v5 = vsel %vm191_vm6, %v178_v43, %v181_v44  ;;  %v426_v50 = vsel %vm424_vm7, %v425_v2, %v2233_v42  ;;  %v203_v57 = vsel %vm191_vm6, %v181_v44, %v184_v62 }
  0xa2   :  { %v196_v6 = vsel %vm194_vm10, %v184_v62, 2102212464  ;;  %v200_v7 = vsel %vm194_vm10, %v187_v3, 920167782  ;;  %v427_v9 = vadd.s32 %v426_v50, %v422_v60  ;;  %v195_v10 = vsel %vm191_vm6, %v175_v48, %v178_v43 }
  0xa3   :  { %v201_v11 = vsel %vm193_vm9, %v184_v62, %v200_v7  ;;  %v204_v12 = vsel %vm194_vm10, %v190_v4, 1326507024  ;;  %v197_v13 = vsel %vm193_vm9, %v181_v44, %v196_v6  ;;  %v481_v16 = vadd.s32 1, %v2205_v58 }
  0xa4   :  { %v202_v14 = vsel %vm192_vm8, %v199_v5, %v201_v11  ;;  %v205_v15 = vsel %vm193_vm9, %v187_v3, %v204_v12  ;;  %v428_v19 = vadd.s32 536870912, %v427_v9  ;;  %v478_v29 = vand.u32 8388607, %v471_v53 }
  0xa5   :  { %v206_v20 = vsel %vm192_vm8, %v203_v57, %v205_v15  ;;  %v2256_v21 = vmul.u32.u64.low %v2201_v52, %v202_v14  ;;  %v2257_v22 = vmul.u32.u64.high %v2201_v52, %v202_v14, %v2256_v21  ;;  %vm482_vm11 = vcmp.gt.s32.totalorder %v481_v16, 0 }
  0xa6   :  { %v2261_v25 = vmul.u32.u64.low %v2201_v52, %v206_v20  ;;  %v2262_v27 = vmul.u32.u64.high %v2201_v52, %v206_v20, %v2261_v25  ;;  %v429_v30 = vshrl.u32 %v428_v19, 30  ;;  %v198_v58 = vsel %vm192_vm8, %v195_v10, %v197_v13 }
  0xa7   :  { %v483_v31 = vsel %vm482_vm11, %v481_v16, 0  ;;  %v217_v34 = vadd.s32 1, %v2257_v22  ;;  %v2271_v35 = vadd.f32 %v2171_v18, %v2195_v49  ;;  %v214_v37 = vmul.u32 %v2201_v52, %v198_v58 }
  0xa8   :  { %v485_v32 = vand.u32 31, %v483_v31  ;;  %v430_v33 = vshll.u32 %v429_v30, 30  ;;  %vm216_vm12 = vc.u32 %v2262_v27, %v2256_v21  ;;  %v479_v38 = vor.u32 8388608, %v478_v29 }
  0xa9   :  { %v218_v51 = vsel %vm216_vm12, %v217_v34, %v2257_v22  ;;  %v453_v43 = vsub.s32 4, %v429_v30  ;;  %v423_v52 = vadd.s32 %v2232_v41, %v2229_v40  ;;  %v263_v47 = vand.u32 2147483647, %v2271_v35 }
  0xaa   :  { %v486_v39 = vsub.s32 32, %v485_v32  ;;  %v2276_v42 = vsub.s32 %v427_v9, %v430_v33  ;;  %v219_v44 = vadd.s32 %v218_v51, %v214_v37  ;;  %v2290_v54 = vshll.u32 %v479_v38, 8 }
  0xab   :  { %v266_v56 = vand.u32 2139095040, %v2271_v35  ;;  %v2294_v62 = vshrl.u32 %v483_v31, 5  ;;  %v2300_v40 = vsel %vm369_vm13, %v453_v43, %v429_v30  ;;  %v488_v2 = vshll.u32 %v2084_v55, %v485_v32 }
  0xac   :  { %v433_v45 = vsub.s32 0, %v2276_v42  ;;  %v220_v48 = vadd.s32 536870912, %v219_v44  ;;  %v489_v46 = vshrl.u32 %v2085_v59, %v486_v39  ;;  %v492_v26 = vshrl.u32 %v2086_v61, %v486_v39 }
  0xad   :  { %v495_v0 = vshrl.u32 %v2087_v63, %v486_v39  ;;  %v498_v3 = vshrl.u32 %v2088_v1, %v486_v39  ;;  %v491_v5 = vshll.u32 %v2085_v59, %v485_v32  ;;  %v494_v50 = vshll.u32 %v2086_v61, %v485_v32 }
  0xae   :  { %v1887_v60 = vmin.u32 %v433_v45, %v2276_v42  ;;  %v221_v41 = vshrl.u32 %v220_v48, 30  ;;  %v501_v6 = vshrl.u32 %v2089_v8, %v486_v39  ;;  %v490_v57 = vor.u32 %v489_v46, %v488_v2 }
  0xaf   :  { %v497_v9 = vshll.u32 %v2087_v63, %v485_v32  ;;  %v267_v10 = vshrl.u32 %v266_v56, 23  ;;  %v493_v12 = vor.u32 %v492_v26, %v491_v5  ;;  %v496_v13 = vor.u32 %v495_v0, %v494_v50 }
  0xb0   :  { %v435_v4 = vclz %v1887_v60  ;;  %v222_v7 = vshll.u32 %v221_v41, 30  ;;  %v500_v14 = vshll.u32 %v2088_v1, %v485_v32  ;;  %v456_v15 = vsel %vm2282_vm14, 0, %v2300_v40 }
  0xb1   :  { %v487_v19 = vshrl.u32 %v2084_v55, %v486_v39  ;;  %v499_v20 = vor.u32 %v498_v3, %v497_v9  ;;  %v245_v22 = vsub.s32 4, %v221_v41  ;;  %vm503_vm1 = vcmp.lt.s32.totalorder %v2294_v62, 1 }
  0xb2   :  { %v1888_v11 = vadd.s32 4294967294, %v435_v4  ;;  %v2313_v16 = vsub.s32 %v219_v44, %v222_v7  ;;  %v502_v25 = vor.u32 %v501_v6, %v500_v14  ;;  %vm505_vm2 = vcmp.lt.s32.totalorder %v2294_v62, 3 }
  0xb3   :  { %vm506_vm3 = vcmp.lt.s32.totalorder %v2294_v62, 4  ;;  %vm2322_vm4 = vcmp.le.f32.partialorder %v159_v28, 0.7853982  ;;  %v511_v34 = vsel %vm503_vm1, %v490_v57, %v493_v12  ;;  %v515_v51 = vsel %vm503_vm1, %v493_v12, %v496_v13 }
  0xb4   :  { %vm1889_vm0 = vcmp.lt.s32.totalorder %v1888_v11, 0  ;;  %v225_v30 = vsub.s32 0, %v2313_v16  ;;  %v508_v33 = vsel %vm506_vm3, %v496_v13, 2102212464  ;;  %v512_v39 = vsel %vm506_vm3, %v499_v20, 920167782 }
  0xb5   :  { %v438_v29 = vsel %vm1889_vm0, 0, %v1888_v11  ;;  %v513_v28 = vsel %vm505_vm2, %v496_v13, %v512_v39  ;;  %v516_v45 = vsel %vm506_vm3, %v502_v25, 1326507024  ;;  %vm504_vm5 = vcmp.lt.s32.totalorder %v2294_v62, 2 }
  0xb6   :  { %v439_v58 = vsub.s32 32, %v438_v29  ;;  %v443_v31 = vsub.s32 4294967266, %v438_v29  ;;  %v440_v37 = vshll.u32 %v2276_v42, %v438_v29  ;;  %v1879_v38 = vmin.u32 %v225_v30, %v2313_v16 }
  0xb7   :  { %v507_v46 = vsel %vm503_vm1, %v487_v19, %v490_v57  ;;  %v509_v42 = vsel %vm505_vm2, %v493_v12, %v508_v33  ;;  %v514_v26 = vsel %vm504_vm5, %v511_v34, %v513_v28  ;;  %v246_v5 = vsel %vm161_vm15, %v245_v22, %v221_v41 }
  0xb8   :  { %v441_v43 = vshrl.u32 %v423_v52, %v439_v58  ;;  %v444_v44 = vadd.s32 127, %v443_v31  ;;  %v227_v48 = vclz %v1879_v38  ;;  %v517_v52 = vsel %vm505_vm2, %v499_v20, %v516_v45 }
  0xb9   :  { %v518_v40 = vsel %vm504_vm5, %v515_v51, %v517_v52  ;;  %v2342_v2 = vmul.u32.u64.low %v2290_v54, %v514_v26  ;;  %v2343_v3 = vmul.u32.u64.high %v2290_v54, %v514_v26, %v2342_v2  ;;  %v215_v7 = vadd.s32 %v2256_v21, %v2262_v27  ;;  %v63_v27 = vpop.permute.xlu1 %62 }
  0xba   :  { %v442_v56 = vor.u32 %v441_v43, %v440_v37  ;;  %v445_v60 = vshll.u32 %v444_v44, 23  ;;  %v1880_v0 = vadd.s32 4294967294, %v227_v48  ;;  %v510_v62 = vsel %vm504_vm5, %v507_v46, %v509_v42  ;;  %v58_v44 = vpop.permute.xlu0 %57 }
  0xbb   :  { %v2348_v50 = vmul.u32.u64.low %v2290_v54, %v518_v40  ;;  %v2349_v6 = vmul.u32.u64.high %v2290_v54, %v518_v40, %v2348_v50  ;;  %v1882_v57 = vadd.s32 4294967169, %v267_v10  ;;  %v460_v12 = vadd.s32 3, %v456_v15 }
  0xbc   :  { %v446_v4 = vor.u32 4788187, %v445_v60  ;;  %vm1881_vm6 = vcmp.lt.s32.totalorder %v1880_v0, 0  ;;  %v449_v11 = vcvt.s32.f32 %v442_v56  ;;  %v248_v20 = vsel %vm2322_vm4, 0, %v246_v5 }
  0xbd   :  { %v230_v13 = vsel %vm1881_vm6, 0, %v1880_v0  ;;  %v529_v41 = vadd.s32 1, %v2343_v3  ;;  %v526_v25 = vmul.u32 %v2290_v54, %v510_v62  ;;  %vm528_vm7 = vc.u32 %v2349_v6, %v2342_v2 }
  0xbe   :  { %v447_v9 = vand.u32 2147483647, %v446_v4  ;;  %v231_v14 = vsub.s32 32, %v230_v13  ;;  %v235_v19 = vsub.s32 4294967266, %v230_v13  ;;  %v273_v21 = vadd.s32 1, %v1882_v57 }
  0xbf   :  { %v232_v10 = vshll.u32 %v2313_v16, %v230_v13  ;;  %v530_v15 = vsel %vm528_vm7, %v529_v41, %v2343_v3  ;;  %v270_v33 = vand.u32 8388607, %v263_v47  ;;  %v126_v54 = vmul.f32 %v2166_v17, %v63_v27 }
  0xc0   :  { %v450_v22 = vmul.f32 %v449_v11, %v447_v9  ;;  %v233_v29 = vshrl.u32 %v215_v7, %v231_v14  ;;  %v236_v30 = vadd.s32 127, %v235_v19  ;;  %v531_v31 = vadd.s32 %v530_v15, %v526_v25 }
  0xc1   :  { %vm274_vm8 = vcmp.gt.s32.totalorder %v273_v21, 0  ;;  %v252_v51 = vadd.s32 3, %v248_v20  ;;  %v2368_v45 = vand.u32 3, %v460_v12  ;;  %v271_v42 = vor.u32 8388608, %v270_v33 }
  0xc2   :  { %v451_v58 = vxor.u32 2147483648, %v450_v22  ;;  %v234_v34 = vor.u32 %v233_v29, %v232_v10  ;;  %v237_v37 = vshll.u32 %v236_v30, 23  ;;  %v275_v38 = vsel %vm274_vm8, %v273_v21, 0 }
  0xc3   :  { %v532_v16 = vadd.s32 536870912, %v531_v31  ;;  %v277_v43 = vand.u32 31, %v275_v38  ;;  %v2373_v52 = vmul.f32 %v2166_v17, %v58_v44  ;;  %v2375_v0 = vand.u32 3, %v252_v51 }
  0xc4   :  { %v452_v39 = vsel %vm369_vm13, %v451_v58, %v450_v22  ;;  %v238_v48 = vor.u32 4788187, %v237_v37  ;;  %v241_v26 = vcvt.s32.f32 %v234_v34  ;;  %v2380_v3 = vadd.f32 %v2171_v18, %v126_v54 }
  0xc5   :  { %v455_v28 = vsel %vm2282_vm14, %v2176_v23, %v452_v39  ;;  %v2370_v46 = vshrl.u32 %v532_v16, 30  ;;  %v278_v56 = vsub.s32 32, %v277_v43  ;;  %v2383_v5 = vadd.s32 %v2342_v2, %v2349_v6 }
  0xc6   :  { %2015 = vcosq.f32 %v455_v28  ;;  %v239_v60 = vand.u32 2147483647, %v238_v48  ;;  %vm466_vm9 = vcmp.eq.s32.totalorder %v2368_v45, 2  ;;  %v280_v57 = vshll.u32 %v2084_v55, %v277_v43 }
  0xc7   :  { %2017 = vsinq.f32 %v455_v28  ;;  %v534_v40 = vshll.u32 %v2370_v46, 30  ;;  %v281_v49 = vshrl.u32 %v2085_v59, %v278_v56  ;;  %v284_v50 = vshrl.u32 %v2086_v61, %v278_v56 }
  0xc8   :  { %v242_v4 = vmul.f32 %v241_v26, %v239_v60  ;;  %v287_v7 = vshrl.u32 %v2087_v63, %v278_v56  ;;  %v290_v9 = vshrl.u32 %v2088_v1, %v278_v56  ;;  %v2392_v11 = vshll.u32 %v271_v42, 8  ;;  %v1825_v60 = vld [vmem:[%s3546_s3 + $0x10] sm:$0xff] }
  0xc9   :  { %v2388_v62 = vsub.s32 %v531_v31, %v534_v40  ;;  %vm463_vm10 = vcmp.eq.s32.totalorder %v2368_v45, 0  ;;  %v2395_v13 = vshrl.u32 %v275_v38, 5  ;;  %v283_v2 = vshll.u32 %v2085_v59, %v277_v43 }
  0xca   :  { %v243_v12 = vxor.u32 2147483648, %v242_v4  ;;  %v286_v6 = vshll.u32 %v2086_v61, %v277_v43  ;;  %vm462_vm11 = vcmp.lt.s32.totalorder %v2368_v45, 2  ;;  %v282_v19 = vor.u32 %v281_v49, %v280_v57 }
  0xcb   :  { %v537_v14 = vsub.s32 0, %v2388_v62  ;;  %v289_v20 = vshll.u32 %v2087_v63, %v277_v43  ;;  %v679_v41 = vand.u32 2147483647, %v2380_v3  ;;  %vm459_vm12 = vweird.f32 %v2176_v23 }
  0xcc   :  { %v244_v22 = vsel %vm161_vm15, %v243_v12, %v242_v4  ;;  %v285_v25 = vor.u32 %v284_v50, %v283_v2  ;;  %v288_v21 = vor.u32 %v287_v7, %v286_v6  ;;  %v293_v27 = vshrl.u32 %v2089_v8, %v278_v56 }
  0xcd   :  { %vm1855_vm13 = vcmask 261120   ;;  %v247_v10 = vsel %vm2322_vm4, %v2179_v24, %v244_v22  ;;  %v1891_v29 = vmin.u32 %v537_v14, %v2388_v62  ;;  %v291_v30 = vor.u32 %v290_v9, %v289_v20 }
  0xce   :  { %v292_v15 = vshll.u32 %v2088_v1, %v277_v43  ;;  %2019 = vcosq.f32 %v247_v10  ;;  %v557_v58 = vsub.s32 4, %v2370_v46  ;;  %v279_v31 = vshrl.u32 %v2084_v55, %v278_v56 }
  0xcf   :  { %vm295_vm14 = vcmp.lt.s32.totalorder %v2395_v13, 1  ;;  %2021 = vsinq.f32 %v247_v10  ;;  %vm473_vm15 = vcmp.lt.s32.totalorder %v2191_v36, 0  ;;  %v539_v34 = vclz %v1891_v29 }
  0xd0   :  { %v2016_v33 = vpop.eup %2015  ;;  %v294_v37 = vor.u32 %v293_v27, %v292_v15  ;;  %vm296_vm0 = vcmp.lt.s32.totalorder %v2395_v13, 2  ;;  %vm297_vm1 = vcmp.lt.s32.totalorder %v2395_v13, 3  ;;  %vm298_vm2 = vcmp.lt.s32.totalorder %v2395_v13, 4  ;;  %v1823_v13 = vld [vmem:[%s3546_s3] sm:$0xff] }
  0xd1   :  { %v2018_v32 = vpop.eup %2017  ;;  %v467_v38 = vxor.u32 2147483648, %v2016_v33  ;;  %v303_v54 = vsel %vm295_vm14, %v282_v19, %v285_v25  ;;  %v1892_v51 = vadd.s32 4294967294, %v539_v34  ;;  %v300_v16 = vsel %vm298_vm2, %v288_v21, 2102212464 }
  0xd2   :  { %v464_v39 = vxor.u32 2147483648, %v2018_v32  ;;  %v304_v43 = vsel %vm298_vm2, %v291_v30, 920167782  ;;  %vm2425_vm3 = vcmp.le.f32.partialorder %v471_v53, 0.7853982  ;;  %v299_v48 = vsel %vm295_vm14, %v279_v31, %v282_v19 }
  0xd3   :  { %v468_v44 = vsel %vm466_vm9, %v467_v38, %v2018_v32  ;;  %v305_v42 = vsel %vm297_vm1, %v288_v21, %v304_v43  ;;  %v307_v56 = vsel %vm295_vm14, %v285_v25, %v288_v21  ;;  %vm1893_vm4 = vcmp.lt.s32.totalorder %v1892_v51, 0 }
  0xd4   :  { %v465_v26 = vsel %vm463_vm10, %v2016_v33, %v464_v39  ;;  %v306_v53 = vsel %vm296_vm0, %v303_v54, %v305_v42  ;;  %v308_v40 = vsel %vm298_vm2, %v294_v37, 1326507024  ;;  %vm254_vm5 = vcmp.lt.s32.totalorder %v2375_v0, 2 }
  0xd5   :  { %v469_v49 = vsel %vm462_vm11, %v465_v26, %v468_v44  ;;  %v542_v4 = vsel %vm1893_vm4, 0, %v1892_v51  ;;  %v301_v50 = vsel %vm297_vm1, %v285_v25, %v300_v16  ;;  %v309_v7 = vsel %vm297_vm1, %v291_v30, %v308_v40 }
  0xd6   :  { %v470_v57 = vsel %vm459_vm12, nan, %v469_v49  ;;  %vm251_vm6 = vweird.f32 %v2179_v24  ;;  %v543_v9 = vsub.s32 32, %v542_v4  ;;  %v544_v12 = vshll.u32 %v2388_v62, %v542_v4 }
  0xd7   :  { %v547_v2 = vsub.s32 4294967266, %v542_v4  ;;  %v1841_v45 = vadd.f32 %v1825_v60, %v470_v57  ;;  %v310_v6 = vsel %vm296_vm0, %v307_v56, %v309_v7  ;;  %vm255_vm7 = vcmp.eq.s32.totalorder %v2375_v0, 0 }
  0xd8   :  { %v2456_v14 = vmul.u32.u64.low %v2392_v11, %v306_v53  ;;  %v2457_v19 = vmul.u32.u64.high %v2392_v11, %v306_v53, %v2456_v14  ;;  %v545_v20 = vshrl.u32 %v2383_v5, %v543_v9  ;;  %v2020_v21 = vpop.eup %2019  ;;  %vm258_vm8 = vcmp.eq.s32.totalorder %v2375_v0, 2 }
  0xd9   :  { %v548_v22 = vadd.s32 127, %v547_v2  ;;  %v2461_v23 = vmul.u32.u64.low %v2392_v11, %v310_v6  ;;  %v2462_v25 = vmul.u32.u64.high %v2392_v11, %v310_v6, %v2461_v23  ;;  %1858 = vst.msk [vmem:[%s3547_s4 + $0x10] sm:$0xff] %vm1855_vm13, %v1841_v45  ;;  %v558_v62 = vsel %vm473_vm15, %v557_v58, %v2370_v46  ;;  %v2022_v27 = vpop.eup %2021 }
  0xda   :  { %v682_v5 = vand.u32 2139095040, %v2380_v3  ;;  %v259_v10 = vxor.u32 2147483648, %v2020_v21  ;;  %v546_v29 = vor.u32 %v545_v20, %v544_v12  ;;  %v302_v15 = vsel %vm296_vm0, %v299_v48, %v301_v50 }
  0xdb   :  { %v549_v30 = vshll.u32 %v548_v22, 23  ;;  %v256_v31 = vxor.u32 2147483648, %v2022_v27  ;;  %v321_v33 = vadd.s32 1, %v2457_v19  ;;  %v2479_v37 = vadd.f32 %v2171_v18, %v2373_v52 }
  0xdc   :  { %v683_v34 = vshrl.u32 %v682_v5, 23  ;;  %v260_v32 = vsel %vm258_vm8, %v259_v10, %v2022_v27  ;;  %v560_v46 = vsel %vm2425_vm3, 0, %v558_v62  ;;  %v686_v58 = vand.u32 8388607, %v679_v41  ;;  %v73_v5 = vpop.permute.xlu1 %72 }
  0xdd   :  { %v550_v38 = vor.u32 4788187, %v549_v30  ;;  %v257_v54 = vsel %vm255_vm7, %v2020_v21, %v256_v31  ;;  %v318_v39 = vmul.u32 %v2392_v11, %v302_v15  ;;  %vm320_vm9 = vc.u32 %v2462_v25, %v2456_v14 }
  0xde   :  { %v1898_v52 = vadd.s32 4294967169, %v683_v34  ;;  %v261_v51 = vsel %vm254_vm5, %v257_v54, %v260_v32  ;;  %v553_v43 = vcvt.s32.f32 %v546_v29  ;;  %v322_v44 = vsel %vm320_vm9, %v321_v33, %v2457_v19 }
  0xdf   :  { %v551_v16 = vand.u32 2147483647, %v550_v38  ;;  %v262_v48 = vsel %vm251_vm6, nan, %v261_v51  ;;  %v323_v42 = vadd.s32 %v322_v44, %v318_v39  ;;  %v564_v53 = vadd.s32 3, %v560_v46 }
  0xe0   :  { %v689_v56 = vadd.s32 1, %v1898_v52  ;;  %v1839_v60 = vadd.f32 %v1823_v13, %v262_v48  ;;  %v687_v40 = vor.u32 8388608, %v686_v58  ;;  %v575_v4 = vand.u32 2147483647, %v2479_v37 }
  0xe1   :  { %v554_v26 = vmul.f32 %v553_v43, %v551_v16  ;;  %v324_v11 = vadd.s32 536870912, %v323_v42  ;;  %v578_v24 = vand.u32 2139095040, %v2479_v37  ;;  %vm2505_vm11 = vcmp.le.f32.partialorder %v263_v47, 0.7853982 }
  0xe2   :  { %vm690_vm10 = vcmp.gt.s32.totalorder %v689_v56, 0  ;;  %1856 = vst.msk [vmem:[%s3547_s4] sm:$0xff] %vm1855_vm13, %v1839_v60  ;;  %vm265_vm12 = vcmp.lt.s32.totalorder %v2271_v35, 0  ;;  %v2512_v12 = vand.u32 3, %v564_v53  ;;  %v2515_v2 = vadd.s32 %v2456_v14, %v2462_v25 }
  0xe3   :  { %v555_v0 = vxor.u32 2147483648, %v554_v26  ;;  %v691_v49 = vsel %vm690_vm10, %v689_v56, 0  ;;  %v325_v7 = vshrl.u32 %v324_v11, 30  ;;  %v2517_v45 = vshll.u32 %v687_v40, 8 }
  0xe4   :  { %v693_v57 = vand.u32 31, %v691_v49  ;;  %v692_v22 = vshrl.u32 %v691_v49, 5  ;;  %v579_v23 = vshrl.u32 %v578_v24, 23  ;;  %v2524_v21 = vand.u32 8388607, %v575_v4 }
  0xe5   :  { %v556_v9 = vsel %vm473_vm15, %v555_v0, %v554_v26  ;;  %v326_v6 = vshll.u32 %v325_v7, 30  ;;  %v349_v19 = vsub.s32 4, %v325_v7  ;;  %vm570_vm14 = vcmp.eq.s32.totalorder %v2512_v12, 2 }
  0xe6   :  { %v559_v47 = vsel %vm2425_vm3, %v2191_v36, %v556_v9  ;;  %v694_v20 = vsub.s32 32, %v693_v57  ;;  %v696_v14 = vshll.u32 %v2084_v55, %v693_v57  ;;  %v699_v25 = vshll.u32 %v2085_v59, %v693_v57 }
  0xe7   :  { %2023 = vcosq.f32 %v559_v47  ;;  %v2526_v62 = vsub.s32 %v323_v42, %v326_v6  ;;  %v702_v10 = vshll.u32 %v2086_v61, %v693_v57  ;;  %v2537_v15 = vsel %vm265_vm12, %v349_v19, %v325_v7 }
  0xe8   :  { %2025 = vsinq.f32 %v559_v47  ;;  %v697_v28 = vshrl.u32 %v2085_v59, %v694_v20  ;;  %v700_v27 = vshrl.u32 %v2086_v61, %v694_v20  ;;  %v703_v29 = vshrl.u32 %v2087_v63, %v694_v20 }
  0xe9   :  { %v329_v30 = vsub.s32 0, %v2526_v62  ;;  %v705_v31 = vshll.u32 %v2087_v63, %v693_v57  ;;  %v706_v33 = vshrl.u32 %v2088_v1, %v694_v20  ;;  %v128_v46 = vmul.f32 %v2166_v17, %v73_v5 }
  0xea   :  { %v698_v34 = vor.u32 %v697_v28, %v696_v14  ;;  %v701_v32 = vor.u32 %v700_v27, %v699_v25  ;;  %v704_v38 = vor.u32 %v703_v29, %v702_v10  ;;  %vm567_vm15 = vcmp.eq.s32.totalorder %v2512_v12, 0  ;;  %v1826_v28 = vld [vmem:[%s3546_s3 + $0x18] sm:$0xff] }
  0xeb   :  { %v1883_v58 = vmin.u32 %v329_v30, %v2526_v62  ;;  %v707_v13 = vor.u32 %v706_v33, %v705_v31  ;;  %v709_v54 = vshrl.u32 %v2089_v8, %v694_v20  ;;  %v583_v39 = vor.u32 8388608, %v2524_v21 }
  0xec   :  { %vm566_vm0 = vcmp.lt.s32.totalorder %v2512_v12, 2  ;;  %v352_v52 = vsel %vm2505_vm11, 0, %v2537_v15  ;;  %v695_v51 = vshrl.u32 %v2084_v55, %v694_v20  ;;  %v708_v16 = vshll.u32 %v2088_v1, %v693_v57 }
  0xed   :  { %v1894_v17 = vadd.s32 4294967169, %v579_v23  ;;  %vm563_vm1 = vweird.f32 %v2191_v36  ;;  %v331_v43 = vclz %v1883_v58  ;;  %vm711_vm2 = vcmp.lt.s32.totalorder %v692_v22, 1 }
  0xee   :  { %vm713_vm3 = vcmp.lt.s32.totalorder %v692_v22, 3  ;;  %vm714_vm4 = vcmp.lt.s32.totalorder %v692_v22, 4  ;;  %v710_v44 = vor.u32 %v709_v54, %v708_v16  ;;  %v715_v48 = vsel %vm711_vm2, %v695_v51, %v698_v34 }
  0xef   :  { %v716_v42 = vsel %vm714_vm4, %v704_v38, 2102212464  ;;  %v719_v56 = vsel %vm711_vm2, %v698_v34, %v701_v32  ;;  %v1884_v60 = vadd.s32 4294967294, %v331_v43  ;;  %v720_v53 = vsel %vm714_vm4, %v707_v13, 920167782 }
  0xf0   :  { %v717_v26 = vsel %vm713_vm3, %v701_v32, %v716_v42  ;;  %v723_v40 = vsel %vm711_vm2, %v701_v32, %v704_v38  ;;  %vm712_vm5 = vcmp.lt.s32.totalorder %v692_v22, 2  ;;  %v721_v0 = vsel %vm713_vm3, %v704_v38, %v720_v53 }
  0xf1   :  { %v2024_v11 = vpop.eup %2023  ;;  %v724_v49 = vsel %vm714_vm4, %v710_v44, 1326507024  ;;  %v585_v24 = vadd.s32 1, %v1894_v17  ;;  %vm1885_vm6 = vcmp.lt.s32.totalorder %v1884_v60, 0  ;;  %v718_v9 = vsel %vm712_vm5, %v715_v48, %v717_v26 }
  0xf2   :  { %v2026_v7 = vpop.eup %2025  ;;  %v571_v57 = vxor.u32 2147483648, %v2024_v11  ;;  %v725_v47 = vsel %vm713_vm3, %v707_v13, %v724_v49  ;;  %v334_v19 = vsel %vm1885_vm6, 0, %v1884_v60  ;;  %v722_v20 = vsel %vm712_vm5, %v719_v56, %v721_v0 }
  0xf3   :  { %v568_v6 = vxor.u32 2147483648, %v2026_v7  ;;  %v726_v23 = vsel %vm712_vm5, %v723_v40, %v725_v47  ;;  %v335_v14 = vsub.s32 32, %v334_v19  ;;  %v336_v25 = vshll.u32 %v2526_v62, %v334_v19 }
  0xf4   :  { %v572_v21 = vsel %vm570_vm14, %v571_v57, %v2026_v7  ;;  %v339_v5 = vsub.s32 4294967266, %v334_v19  ;;  %v2566_v22 = vmul.u32.u64.low %v2517_v45, %v726_v23  ;;  %v2567_v10 = vmul.u32.u64.high %v2517_v45, %v726_v23, %v2566_v22 }
  0xf5   :  { %v569_v27 = vsel %vm567_vm15, %v2024_v11, %v568_v6  ;;  %vm586_vm7 = vcmp.gt.s32.totalorder %v585_v24, 0  ;;  %v337_v30 = vshrl.u32 %v2515_v2, %v335_v14  ;;  %v2579_v54 = vadd.s32 3, %v352_v52 }
  0xf6   :  { %v573_v29 = vsel %vm566_vm0, %v569_v27, %v572_v21  ;;  %v340_v15 = vadd.s32 127, %v339_v5  ;;  %v587_v62 = vsel %vm586_vm7, %v585_v24, 0  ;;  %v734_v12 = vmul.u32 %v2517_v45, %v718_v9 }
  0xf7   :  { %v574_v31 = vsel %vm563_vm1, nan, %v573_v29  ;;  %v2575_v33 = vmul.u32.u64.low %v2517_v45, %v722_v20  ;;  %v2576_v34 = vmul.u32.u64.high %v2517_v45, %v722_v20, %v2575_v33  ;;  %v338_v38 = vor.u32 %v337_v30, %v336_v25 }
  0xf8   :  { %v1842_v32 = vadd.f32 %v1826_v28, %v574_v31  ;;  %v341_v58 = vshll.u32 %v340_v15, 23  ;;  %v589_v13 = vand.u32 31, %v587_v62  ;;  %v2582_v51 = vshll.u32 %v583_v39, 8  ;;  %v68_v15 = vpop.permute.xlu0 %67 }
  0xf9   :  { %v2585_v2 = vadd.f32 %v2171_v18, %v128_v46  ;;  %vm736_vm8 = vc.u32 %v2567_v10, %v2575_v33  ;;  %v588_v16 = vshrl.u32 %v587_v62, 5  ;;  %v345_v52 = vcvt.s32.f32 %v338_v38 }
  0xfa   :  { %1859 = vst.msk [vmem:[%s3547_s4 + $0x18] sm:$0xff] %vm1855_vm13, %v1842_v32  ;;  %v342_v36 = vor.u32 4788187, %v341_v58  ;;  %v590_v17 = vsub.s32 32, %v589_v13  ;;  %v737_v43 = vadd.s32 1, %v2576_v34  ;;  %v592_v45 = vshll.u32 %v2084_v55, %v589_v13 }
  0xfb   :  { %v595_v39 = vshll.u32 %v2085_v59, %v589_v13  ;;  %v598_v48 = vshll.u32 %v2086_v61, %v589_v13  ;;  %v601_v60 = vshll.u32 %v2087_v63, %v589_v13  ;;  %v604_v7 = vshll.u32 %v2088_v1, %v589_v13 }
  0xfc   :  { %v343_v18 = vand.u32 2147483647, %v342_v36  ;;  %v593_v46 = vshrl.u32 %v2085_v59, %v590_v17  ;;  %v596_v44 = vshrl.u32 %v2086_v61, %v590_v17  ;;  %v738_v42 = vsel %vm736_vm8, %v737_v43, %v2576_v34 }
  0xfd   :  { %v599_v56 = vshrl.u32 %v2087_v63, %v590_v17  ;;  %v602_v26 = vshrl.u32 %v2088_v1, %v590_v17  ;;  %v739_v40 = vadd.s32 %v738_v42, %v734_v12  ;;  %v605_v57 = vshrl.u32 %v2089_v8, %v590_v17 }
  0xfe   :  { %v346_v53 = vmul.f32 %v345_v52, %v343_v18  ;;  %v594_v11 = vor.u32 %v593_v46, %v592_v45  ;;  %v597_v0 = vor.u32 %v596_v44, %v595_v39  ;;  %vm607_vm9 = vcmp.lt.s32.totalorder %v588_v16, 1 }
  0xff   :  { %v600_v49 = vor.u32 %v599_v56, %v598_v48  ;;  %v603_v24 = vor.u32 %v602_v26, %v601_v60  ;;  %v740_v47 = vadd.s32 536870912, %v739_v40  ;;  %vm610_vm10 = vcmp.lt.s32.totalorder %v588_v16, 4 }
 0x100   :  { %v347_v9 = vxor.u32 2147483648, %v346_v53  ;;  %v606_v6 = vor.u32 %v605_v57, %v604_v7  ;;  %vm609_vm14 = vcmp.lt.s32.totalorder %v588_v16, 3  ;;  %v615_v19 = vsel %vm607_vm9, %v594_v11, %v597_v0 }
 0x101   :  { %v616_v20 = vsel %vm610_vm10, %v603_v24, 920167782  ;;  %v741_v21 = vshrl.u32 %v740_v47, 30  ;;  %vm608_vm15 = vcmp.lt.s32.totalorder %v588_v16, 2  ;;  %v612_v5 = vsel %vm610_vm10, %v600_v49, 2102212464 }
 0x102   :  { %v348_v23 = vsel %vm265_vm12, %v347_v9, %v346_v53  ;;  %v617_v14 = vsel %vm609_vm14, %v600_v49, %v616_v20  ;;  %v619_v27 = vsel %vm607_vm9, %v597_v0, %v600_v49  ;;  %v591_v29 = vshrl.u32 %v2084_v55, %v590_v17  ;;  %v2636_v17 = vld [vmem:[%s3544_s1] ss:$0 sm:$0xff] }
 0x103   :  { %v351_v25 = vsel %vm2505_vm11, %v2271_v35, %v348_v23  ;;  %v618_v28 = vsel %vm608_vm15, %v615_v19, %v617_v14  ;;  %v742_v22 = vshll.u32 %v741_v21, 30  ;;  %v620_v30 = vsel %vm610_vm10, %v606_v6, 1326507024 }
 0x104   :  { %2027 = vcosq.f32 %v351_v25  ;;  %v621_v62 = vsel %vm609_vm14, %v603_v24, %v620_v30  ;;  %v2620_v31 = vmul.u32.u64.low %v2582_v51, %v618_v28  ;;  %v2621_v50 = vmul.u32.u64.high %v2582_v51, %v618_v28, %v2620_v31 }
 0x105   :  { %2029 = vsinq.f32 %v351_v25  ;;  %v2624_v34 = vsub.s32 %v739_v40, %v742_v22  ;;  %v611_v32 = vsel %vm607_vm9, %v591_v29, %v594_v11  ;;  %v613_v38 = vsel %vm609_vm14, %v597_v0, %v612_v5  ;;  %v1824_v25 = vld [vmem:[%s3546_s3 + $0x8] sm:$0xff] }
 0x106   :  { %v622_v58 = vsel %vm608_vm15, %v619_v27, %v621_v62  ;;  %v765_v13 = vsub.s32 4, %v741_v21  ;;  %v127_v52 = vmul.f32 %v2636_v17, %v68_v15  ;;  %v890_v45 = vand.u32 2139095040, %v2585_v2 }
 0x107   :  { %v2630_v12 = vmul.u32.u64.low %v2582_v51, %v622_v58  ;;  %v2631_v36 = vmul.u32.u64.high %v2582_v51, %v622_v58, %v2630_v12  ;;  %v745_v43 = vsub.s32 0, %v2624_v34  ;;  %v357_v39 = vand.u32 3, %v2579_v54  ;;  %v2654_v54 = vld [vmem:[%s3545_s2] ss:$0 sm:$0xff] }
 0x108   :  { %v614_v18 = vsel %vm608_vm15, %v611_v32, %v613_v38  ;;  %v633_v46 = vadd.s32 1, %v2621_v50  ;;  %vm681_vm11 = vcmp.lt.s32.totalorder %v2380_v3, 0  ;;  %v887_v48 = vand.u32 2147483647, %v2585_v2 }
 0x109   :  { %v1899_v44 = vmin.u32 %v745_v43, %v2624_v34  ;;  %v891_v42 = vshrl.u32 %v890_v45, 23  ;;  %v766_v56 = vsel %vm681_vm11, %v765_v13, %v741_v21  ;;  %vm632_vm12 = vc.u32 %v2631_v36, %v2620_v31 }
 0x10a   :  { %v2657_v16 = vadd.f32 %v2654_v54, %v127_v52  ;;  %vm355_vm0 = vweird.f32 %v2271_v35  ;;  %vm2662_vm1 = vcmp.le.f32.partialorder %v679_v41, 0.7853982  ;;  %v630_v53 = vmul.u32 %v2582_v51, %v614_v18 }
 0x10b   :  { %v747_v26 = vclz %v1899_v44  ;;  %vm358_vm2 = vcmp.lt.s32.totalorder %v357_v39, 2  ;;  %vm359_vm3 = vcmp.eq.s32.totalorder %v357_v39, 0  ;;  %v634_v40 = vsel %vm632_vm12, %v633_v46, %v2621_v50 }
 0x10c   :  { %v1906_v11 = vadd.s32 4294967169, %v891_v42  ;;  %v768_v24 = vsel %vm2662_vm1, 0, %v766_v56  ;;  %v635_v7 = vadd.s32 %v634_v40, %v630_v53  ;;  %v894_v41 = vand.u32 8388607, %v887_v48 }
 0x10d   :  { %v1900_v49 = vadd.s32 4294967294, %v747_v26  ;;  %vm362_vm4 = vcmp.eq.s32.totalorder %v357_v39, 2  ;;  %v786_v51 = vand.u32 2139095040, %v2657_v16  ;;  %v735_v19 = vadd.s32 %v2575_v33, %v2567_v10 }
 0x10e   :  { %v2028_v0 = vpop.eup %2027  ;;  %v897_v47 = vadd.s32 1, %v1906_v11  ;;  %v636_v20 = vadd.s32 536870912, %v635_v7  ;;  %v772_v14 = vadd.s32 3, %v768_v24  ;;  %v895_v22 = vor.u32 8388608, %v894_v41 }
 0x10f   :  { %v2030_v57 = vpop.eup %2029  ;;  %v363_v9 = vxor.u32 2147483648, %v2028_v0  ;;  %vm1901_vm5 = vcmp.lt.s32.totalorder %v1900_v49, 0  ;;  %v787_v10 = vshrl.u32 %v786_v51, 23  ;;  %vm2687_vm7 = vcmp.le.f32.partialorder %v575_v4, 0.7853982 }
 0x110   :  { %v360_v6 = vxor.u32 2147483648, %v2030_v57  ;;  %v750_v21 = vsel %vm1901_vm5, 0, %v1900_v49  ;;  %vm898_vm6 = vcmp.gt.s32.totalorder %v897_v47, 0  ;;  %v637_v30 = vshrl.u32 %v636_v20, 30 }
 0x111   :  { %v364_v23 = vsel %vm362_vm4, %v363_v9, %v2030_v57  ;;  %v751_v28 = vsub.s32 32, %v750_v21  ;;  %v755_v27 = vsub.s32 4294967266, %v750_v21  ;;  %v899_v15 = vsel %vm898_vm6, %v897_v47, 0 }
 0x112   :  { %v361_v5 = vsel %vm359_vm3, %v2028_v0, %v360_v6  ;;  %v752_v62 = vshll.u32 %v2624_v34, %v750_v21  ;;  %v638_v58 = vshll.u32 %v637_v30, 30  ;;  %v2683_v13 = vshrl.u32 %v899_v15, 5 }
 0x113   :  { %v365_v29 = vsel %vm358_vm2, %v361_v5, %v364_v23  ;;  %v753_v50 = vshrl.u32 %v735_v19, %v751_v28  ;;  %v756_v32 = vadd.s32 127, %v755_v27  ;;  %v901_v12 = vand.u32 31, %v899_v15 }
 0x114   :  { %v366_v33 = vsel %vm355_vm0, nan, %v365_v29  ;;  %vm577_vm8 = vcmp.lt.s32.totalorder %v2479_v37, 0  ;;  %v2696_v35 = vand.u32 3, %v772_v14  ;;  %v2698_v34 = vsub.s32 %v635_v7, %v638_v58 }
 0x115   :  { %v1840_v38 = vadd.f32 %v1824_v25, %v366_v33  ;;  %v754_v52 = vor.u32 %v753_v50, %v752_v62  ;;  %v757_v43 = vshll.u32 %v756_v32, 23  ;;  %v661_v39 = vsub.s32 4, %v637_v30 }
 0x116   :  { %v902_v18 = vsub.s32 32, %v901_v12  ;;  %v631_v4 = vadd.s32 %v2620_v31, %v2631_v36  ;;  %v2702_v44 = vshll.u32 %v895_v22, 8  ;;  %v1902_v42 = vadd.s32 4294967169, %v787_v10 }
 0x117   :  { %1857 = vst.msk [vmem:[%s3547_s4 + $0x8] sm:$0xff] %vm1855_vm13, %v1840_v38  ;;  %v758_v46 = vor.u32 4788187, %v757_v43  ;;  %v761_v56 = vcvt.s32.f32 %v754_v52  ;;  %v641_v26 = vsub.s32 0, %v2698_v34  ;;  %vm919_vm9 = vcmp.lt.s32.totalorder %v2683_v13, 1 }
 0x118   :  { %v905_v53 = vshrl.u32 %v2085_v59, %v902_v18  ;;  %v908_v11 = vshrl.u32 %v2086_v61, %v902_v18  ;;  %v910_v0 = vshll.u32 %v2086_v61, %v901_v12  ;;  %v911_v49 = vshrl.u32 %v2087_v63, %v902_v18 }
 0x119   :  { %v759_v40 = vand.u32 2147483647, %v758_v46  ;;  %v1895_v24 = vmin.u32 %v641_v26, %v2698_v34  ;;  %v662_v31 = vsel %vm577_vm8, %v661_v39, %v637_v30  ;;  %v904_v36 = vshll.u32 %v2084_v55, %v901_v12 }
 0x11a   :  { %v907_v7 = vshll.u32 %v2085_v59, %v901_v12  ;;  %v912_v57 = vor.u32 %v911_v49, %v910_v0  ;;  %v913_v9 = vshll.u32 %v2087_v63, %v901_v12  ;;  %v914_v47 = vshrl.u32 %v2088_v1, %v902_v18 }
 0x11b   :  { %v762_v41 = vmul.f32 %v761_v56, %v759_v40  ;;  %v643_v51 = vclz %v1895_v24  ;;  %v906_v6 = vor.u32 %v905_v53, %v904_v36  ;;  %vm920_vm10 = vcmp.lt.s32.totalorder %v2683_v13, 2 }
 0x11c   :  { %v909_v19 = vor.u32 %v908_v11, %v907_v7  ;;  %v915_v23 = vor.u32 %v914_v47, %v913_v9  ;;  %v916_v21 = vshll.u32 %v2088_v1, %v901_v12  ;;  %v917_v14 = vshrl.u32 %v2089_v8, %v902_v18  ;;  %v83_v7 = vpop.permute.xlu1 %82 }
 0x11d   :  { %v763_v20 = vxor.u32 2147483648, %v762_v41  ;;  %v1896_v25 = vadd.s32 4294967294, %v643_v51  ;;  %v664_v5 = vsel %vm2687_vm7, 0, %v662_v31  ;;  %v903_v28 = vshrl.u32 %v2084_v55, %v902_v18 }
 0x11e   :  { %vm922_vm14 = vcmp.lt.s32.totalorder %v2683_v13, 4  ;;  %v918_v22 = vor.u32 %v917_v14, %v916_v21  ;;  %vm921_vm15 = vcmp.lt.s32.totalorder %v2683_v13, 3  ;;  %v927_v15 = vsel %vm919_vm9, %v906_v6, %v909_v19 }
 0x11f   :  { %v764_v27 = vsel %vm681_vm11, %v763_v20, %v762_v41  ;;  %v924_v29 = vsel %vm922_vm14, %v912_v57, 2102212464  ;;  %vm1897_vm12 = vcmp.lt.s32.totalorder %v1896_v25, 0  ;;  %v928_v10 = vsel %vm922_vm14, %v915_v23, 920167782 }
 0x120   :  { %v767_v30 = vsel %vm2662_vm1, %v2380_v3, %v764_v27  ;;  %v646_v33 = vsel %vm1897_vm12, 0, %v1896_v25  ;;  %v923_v62 = vsel %vm919_vm9, %v903_v28, %v906_v6  ;;  %v929_v50 = vsel %vm921_vm15, %v912_v57, %v928_v10 }
 0x121   :  { %2031 = vcosq.f32 %v767_v30  ;;  %v647_v32 = vsub.s32 32, %v646_v33  ;;  %v651_v38 = vsub.s32 4294967266, %v646_v33  ;;  %v925_v60 = vsel %vm921_vm15, %v909_v19, %v924_v29 }
 0x122   :  { %2033 = vsinq.f32 %v767_v30  ;;  %v648_v58 = vshll.u32 %v2698_v34, %v646_v33  ;;  %v930_v12 = vsel %vm920_vm10, %v927_v15, %v929_v50  ;;  %v931_v52 = vsel %vm919_vm9, %v909_v19, %v912_v57  ;;  %v1828_v50 = vld [vmem:[%s3546_s3 + $0x28] sm:$0xff] }
 0x123   :  { %v932_v43 = vsel %vm922_vm14, %v918_v22, 1326507024  ;;  %v649_v39 = vshrl.u32 %v631_v4, %v647_v32  ;;  %v652_v18 = vadd.s32 127, %v651_v38  ;;  %v793_v56 = vadd.s32 1, %v1902_v42 }
 0x124   :  { %v933_v46 = vsel %vm921_vm15, %v915_v23, %v932_v43  ;;  %v2754_v34 = vmul.u32.u64.low %v2702_v44, %v930_v12  ;;  %v2755_v53 = vmul.u32.u64.high %v2702_v44, %v930_v12, %v2754_v34  ;;  %v783_v40 = vand.u32 2147483647, %v2657_v16 }
 0x125   :  { %v934_v26 = vsel %vm920_vm10, %v931_v52, %v933_v46  ;;  %v650_v11 = vor.u32 %v649_v39, %v648_v58  ;;  %v653_v0 = vshll.u32 %v652_v18, 23  ;;  %v668_v24 = vadd.s32 3, %v664_v5 }
 0x126   :  { %v2760_v49 = vmul.u32.u64.low %v2702_v44, %v934_v26  ;;  %v2761_v4 = vmul.u32.u64.high %v2702_v44, %v934_v26, %v2760_v49  ;;  %v926_v42 = vsel %vm920_vm10, %v923_v62, %v925_v60  ;;  %vm794_vm11 = vcmp.gt.s32.totalorder %v793_v56, 0 }
 0x127   :  { %vm771_vm0 = vweird.f32 %v2380_v3  ;;  %vm774_vm1 = vcmp.lt.s32.totalorder %v2696_v35, 2  ;;  %vm775_vm2 = vcmp.eq.s32.totalorder %v2696_v35, 0  ;;  %v654_v31 = vor.u32 4788187, %v653_v0 }
 0x128   :  { %v795_v36 = vsel %vm794_vm11, %v793_v56, 0  ;;  %vm778_vm3 = vcmp.eq.s32.totalorder %v2696_v35, 2  ;;  %v945_v41 = vadd.s32 1, %v2755_v53  ;;  %v2772_v57 = vand.u32 8388607, %v783_v40 }
 0x129   :  { %v797_v13 = vand.u32 31, %v795_v36  ;;  %v655_v9 = vand.u32 2147483647, %v654_v31  ;;  %v657_v47 = vcvt.s32.f32 %v650_v11  ;;  %v942_v51 = vmul.u32 %v2702_v44, %v926_v42 }
 0x12a   :  { %vm944_vm4 = vc.u32 %v2761_v4, %v2754_v34  ;;  %v2777_v19 = vand.u32 3, %v668_v24  ;;  %v130_v21 = vmul.f32 %v2636_v17, %v83_v7  ;;  %v2793_v38 = vshrl.u32 %v795_v36, 5 }
 0x12b   :  { %v2032_v6 = vpop.eup %2031  ;;  %v946_v20 = vsel %vm944_vm4, %v945_v41, %v2755_v53  ;;  %v798_v23 = vsub.s32 32, %v797_v13  ;;  %v658_v5 = vmul.f32 %v657_v47, %v655_v9  ;;  %v800_v27 = vshll.u32 %v2084_v55, %v797_v13 }
 0x12c   :  { %v2034_v14 = vpop.eup %2033  ;;  %v779_v25 = vxor.u32 2147483648, %v2032_v6  ;;  %v947_v28 = vadd.s32 %v946_v20, %v942_v51  ;;  %v803_v29 = vshll.u32 %v2085_v59, %v797_v13  ;;  %v806_v58 = vshll.u32 %v2086_v61, %v797_v13 }
 0x12d   :  { %v776_v22 = vxor.u32 2147483648, %v2034_v14  ;;  %v801_v44 = vshrl.u32 %v2085_v59, %v798_v23  ;;  %v804_v30 = vshrl.u32 %v2086_v61, %v798_v23  ;;  %v659_v10 = vxor.u32 2147483648, %v658_v5 }
 0x12e   :  { %v780_v15 = vsel %vm778_vm3, %v779_v25, %v2034_v14  ;;  %v948_v33 = vadd.s32 536870912, %v947_v28  ;;  %v807_v62 = vshrl.u32 %v2087_v63, %v798_v23  ;;  %v809_v56 = vshll.u32 %v2087_v63, %v797_v13  ;;  %v78_v25 = vpop.permute.xlu0 %77 }
 0x12f   :  { %v777_v32 = vsel %vm775_vm2, %v2032_v6, %v776_v22  ;;  %v802_v60 = vor.u32 %v801_v44, %v800_v27  ;;  %v660_v52 = vsel %vm577_vm8, %v659_v10, %v658_v5  ;;  %v805_v39 = vor.u32 %v804_v30, %v803_v29 }
 0x130   :  { %v781_v12 = vsel %vm774_vm1, %v777_v32, %v780_v15  ;;  %v949_v43 = vshrl.u32 %v948_v33, 30  ;;  %v663_v46 = vsel %vm2687_vm7, %v2479_v37, %v660_v52  ;;  %v810_v26 = vshrl.u32 %v2088_v1, %v798_v23 }
 0x131   :  { %v782_v18 = vsel %vm771_vm0, nan, %v781_v12  ;;  %2035 = vcosq.f32 %v663_v46  ;;  %v808_v11 = vor.u32 %v807_v62, %v806_v58  ;;  %v812_v49 = vshll.u32 %v2088_v1, %v797_v13 }
 0x132   :  { %v1844_v53 = vadd.f32 %v1828_v50, %v782_v18  ;;  %v950_v35 = vshll.u32 %v949_v43, 30  ;;  %2037 = vsinq.f32 %v663_v46  ;;  %v811_v0 = vor.u32 %v810_v26, %v809_v56 }
 0x133   :  { %v813_v24 = vshrl.u32 %v2089_v8, %v798_v23  ;;  %vm889_vm5 = vcmp.lt.s32.totalorder %v2585_v2, 0  ;;  %v791_v45 = vor.u32 8388608, %v2772_v57  ;;  %vm2819_vm6 = vcmp.le.f32.partialorder %v887_v48, 0.7853982 }
 0x134   :  { %1861 = vst.msk [vmem:[%s3547_s4 + $0x28] sm:$0xff] %vm1855_vm13, %v1844_v53  ;;  %v2814_v3 = vsub.s32 %v947_v28, %v950_v35  ;;  %v973_v31 = vsub.s32 4, %v949_v43  ;;  %vm815_vm7 = vcmp.lt.s32.totalorder %v2793_v38, 1  ;;  %v2825_v7 = vadd.f32 %v2654_v54, %v130_v21 }
 0x135   :  { %v814_v36 = vor.u32 %v813_v24, %v812_v49  ;;  %vm817_vm8 = vcmp.lt.s32.totalorder %v2793_v38, 3  ;;  %vm818_vm9 = vcmp.lt.s32.totalorder %v2793_v38, 4  ;;  %v823_v57 = vsel %vm815_vm7, %v802_v60, %v805_v39 }
 0x136   :  { %v953_v41 = vsub.s32 0, %v2814_v3  ;;  %vm671_vm10 = vcmp.eq.s32.totalorder %v2777_v19, 0  ;;  %v799_v48 = vshrl.u32 %v2084_v55, %v798_v23  ;;  %v820_v13 = vsel %vm818_vm9, %v808_v11, 2102212464 }
 0x137   :  { %v824_v9 = vsel %vm818_vm9, %v811_v0, 920167782  ;;  %v828_v47 = vsel %vm818_vm9, %v814_v36, 1326507024  ;;  %vm670_vm14 = vcmp.lt.s32.totalorder %v2777_v19, 2  ;;  %vm816_vm15 = vcmp.lt.s32.totalorder %v2793_v38, 2 }
 0x138   :  { %v1907_v51 = vmin.u32 %v953_v41, %v2814_v3  ;;  %v825_v6 = vsel %vm817_vm8, %v808_v11, %v824_v9  ;;  %v827_v20 = vsel %vm815_vm7, %v805_v39, %v808_v11  ;;  %vm667_vm12 = vweird.f32 %v2479_v37  ;;  %v1827_v38 = vld [vmem:[%s3546_s3 + $0x20] sm:$0xff] }
 0x139   :  { %vm674_vm11 = vcmp.eq.s32.totalorder %v2777_v19, 2  ;;  %v826_v23 = vsel %vm816_vm15, %v823_v57, %v825_v6  ;;  %v829_v21 = vsel %vm817_vm8, %v811_v0, %v828_v47  ;;  %v831_v14 = vshll.u32 %v791_v45, 8 }
 0x13a   :  { %v955_v5 = vclz %v1907_v51  ;;  %v974_v28 = vsel %vm889_vm5, %v973_v31, %v949_v43  ;;  %v819_v27 = vsel %vm815_vm7, %v799_v48, %v802_v60  ;;  %v821_v22 = vsel %vm817_vm8, %v805_v39, %v820_v13 }
 0x13b   :  { %v830_v44 = vsel %vm816_vm15, %v827_v20, %v829_v21  ;;  %v2855_v29 = vmul.u32.u64.low %v831_v14, %v826_v23  ;;  %v2856_v30 = vmul.u32.u64.high %v831_v14, %v826_v23, %v2855_v29  ;;  %v1098_v15 = vand.u32 2139095040, %v2825_v7  ;;  %v2036_v10 = vpop.eup %2035 }
 0x13c   :  { %v1908_v33 = vadd.s32 4294967294, %v955_v5  ;;  %v2859_v62 = vmul.u32.u64.low %v831_v14, %v830_v44  ;;  %v2860_v50 = vmul.u32.u64.high %v831_v14, %v830_v44, %v2859_v62  ;;  %v129_v32 = vmul.f32 %v2636_v17, %v78_v25  ;;  %v2038_v58 = vpop.eup %2037 }
 0x13d   :  { %v675_v60 = vxor.u32 2147483648, %v2036_v10  ;;  %v822_v12 = vsel %vm816_vm15, %v819_v27, %v821_v22  ;;  %v1095_v52 = vand.u32 2147483647, %v2825_v7  ;;  %v1099_v43 = vshrl.u32 %v1098_v15, 23 }
 0x13e   :  { %v672_v39 = vxor.u32 2147483648, %v2038_v58  ;;  %v943_v18 = vadd.s32 %v2754_v34, %v2761_v4  ;;  %vm1909_vm0 = vcmp.lt.s32.totalorder %v1908_v33, 0  ;;  %v976_v46 = vsel %vm2819_vm6, 0, %v974_v28 }
 0x13f   :  { %v676_v56 = vsel %vm674_vm11, %v675_v60, %v2038_v58  ;;  %v958_v26 = vsel %vm1909_vm0, 0, %v1908_v33  ;;  %v841_v53 = vadd.s32 1, %v2856_v30  ;;  %v1914_v35 = vadd.s32 4294967169, %v1099_v43 }
 0x140   :  { %v673_v11 = vsel %vm671_vm10, %v2036_v10, %v672_v39  ;;  %v959_v0 = vsub.s32 32, %v958_v26  ;;  %v963_v34 = vsub.s32 4294967266, %v958_v26  ;;  %v838_v4 = vmul.u32 %v831_v14, %v822_v12 }
 0x141   :  { %v677_v49 = vsel %vm670_vm14, %v673_v11, %v676_v56  ;;  %v960_v24 = vshll.u32 %v2814_v3, %v958_v26  ;;  %vm840_vm1 = vc.u32 %v2860_v50, %v2855_v29  ;;  %v1105_v45 = vadd.s32 1, %v1914_v35 }
 0x142   :  { %v678_v31 = vsel %vm667_vm12, nan, %v677_v49  ;;  %v961_v36 = vshrl.u32 %v943_v18, %v959_v0  ;;  %v964_v41 = vadd.s32 127, %v963_v34  ;;  %v842_v57 = vsel %vm840_vm1, %v841_v53, %v2856_v30 }
 0x143   :  { %v1843_v48 = vadd.f32 %v1827_v38, %v678_v31  ;;  %v980_v13 = vadd.s32 3, %v976_v46  ;;  %v843_v9 = vadd.s32 %v842_v57, %v838_v4  ;;  %vm1106_vm2 = vcmp.gt.s32.totalorder %v1105_v45, 0 }
 0x144   :  { %v962_v47 = vor.u32 %v961_v36, %v960_v24  ;;  %v965_v51 = vshll.u32 %v964_v41, 23  ;;  %v1102_v19 = vand.u32 8388607, %v1095_v52  ;;  %v1107_v3 = vsel %vm1106_vm2, %v1105_v45, 0 }
 0x145   :  { %1860 = vst.msk [vmem:[%s3547_s4 + $0x20] sm:$0xff] %vm1855_vm13, %v1843_v48  ;;  %v844_v37 = vadd.s32 536870912, %v843_v9  ;;  %v1109_v6 = vand.u32 31, %v1107_v3  ;;  %v2891_v23 = vand.u32 3, %v980_v13  ;;  %v2896_v27 = vadd.f32 %v2654_v54, %v129_v32 }
 0x146   :  { %v966_v20 = vor.u32 4788187, %v965_v51  ;;  %v969_v5 = vcvt.s32.f32 %v962_v47  ;;  %v1103_v28 = vor.u32 8388608, %v1102_v19  ;;  %v2899_v22 = vadd.s32 %v2855_v29, %v2860_v50 }
 0x147   :  { %v2893_v21 = vshrl.u32 %v844_v37, 30  ;;  %v1110_v14 = vsub.s32 32, %v1109_v6  ;;  %v1112_v30 = vshll.u32 %v2084_v55, %v1109_v6  ;;  %v1115_v32 = vshll.u32 %v2085_v59, %v1109_v6 }
 0x148   :  { %v967_v25 = vand.u32 2147483647, %v966_v20  ;;  %v1118_v29 = vshll.u32 %v2086_v61, %v1109_v6  ;;  %v1108_v43 = vshrl.u32 %v1107_v3, 5  ;;  %v1121_v39 = vshll.u32 %v2087_v63, %v1109_v6 }
 0x149   :  { %v846_v44 = vshll.u32 %v2893_v21, 30  ;;  %v1113_v15 = vshrl.u32 %v2085_v59, %v1110_v14  ;;  %v1116_v33 = vshrl.u32 %v2086_v61, %v1110_v14  ;;  %v1119_v62 = vshrl.u32 %v2087_v63, %v1110_v14 }
 0x14a   :  { %v970_v10 = vmul.f32 %v969_v5, %v967_v25  ;;  %v1122_v58 = vshrl.u32 %v2088_v1, %v1110_v14  ;;  %v1125_v50 = vshrl.u32 %v2089_v8, %v1110_v14  ;;  %v1124_v18 = vshll.u32 %v2088_v1, %v1109_v6  ;;  %v93_v25 = vpop.permute.xlu1 %92 }
 0x14b   :  { %v2907_v60 = vsub.s32 %v843_v9, %v846_v44  ;;  %v1114_v56 = vor.u32 %v1113_v15, %v1112_v30  ;;  %v1117_v26 = vor.u32 %v1116_v33, %v1115_v32  ;;  %v1120_v53 = vor.u32 %v1119_v62, %v1118_v29 }
 0x14c   :  { %v971_v12 = vxor.u32 2147483648, %v970_v10  ;;  %vm785_vm3 = vcmp.lt.s32.totalorder %v2657_v16, 0  ;;  %v1123_v38 = vor.u32 %v1122_v58, %v1121_v39  ;;  %v1143_v11 = vshll.u32 %v1103_v28, 8 }
 0x14d   :  { %v849_v46 = vsub.s32 0, %v2907_v60  ;;  %v994_v0 = vand.u32 2139095040, %v2896_v27  ;;  %v869_v49 = vsub.s32 4, %v2893_v21  ;;  %v1126_v24 = vor.u32 %v1125_v50, %v1124_v18 }
 0x14e   :  { %v972_v35 = vsel %vm889_vm5, %v971_v12, %v970_v10  ;;  %v1111_v45 = vshrl.u32 %v2084_v55, %v1110_v14  ;;  %vm1127_vm4 = vcmp.lt.s32.totalorder %v1108_v43, 1  ;;  %vm1130_vm5 = vcmp.lt.s32.totalorder %v1108_v43, 4 }
 0x14f   :  { %v975_v34 = vsel %vm2819_vm6, %v2585_v2, %v972_v35  ;;  %v1903_v4 = vmin.u32 %v849_v46, %v2907_v60  ;;  %vm2927_vm7 = vcmp.le.f32.partialorder %v783_v40, 0.7853982  ;;  %v1132_v42 = vsel %vm1130_vm5, %v1120_v53, 2102212464 }
 0x150   :  { %2039 = vcosq.f32 %v975_v34  ;;  %v1135_v41 = vsel %vm1127_vm4, %v1114_v56, %v1117_v26  ;;  %vm1128_vm6 = vcmp.lt.s32.totalorder %v1108_v43, 2  ;;  %vm1129_vm8 = vcmp.lt.s32.totalorder %v1108_v43, 3 }
 0x151   :  { %2041 = vsinq.f32 %v975_v34  ;;  %v851_v36 = vclz %v1903_v4  ;;  %v1136_v57 = vsel %vm1130_vm5, %v1123_v38, 920167782  ;;  %v1139_v48 = vsel %vm1127_vm4, %v1117_v26, %v1120_v53 }
 0x152   :  { %v1131_v9 = vsel %vm1127_vm4, %v1111_v45, %v1114_v56  ;;  %v1137_v47 = vsel %vm1129_vm8, %v1120_v53, %v1136_v57  ;;  %v1140_v51 = vsel %vm1130_vm5, %v1126_v24, 1326507024  ;;  %v1133_v19 = vsel %vm1129_vm8, %v1117_v26, %v1132_v42  ;;  %v1830_v24 = vld [vmem:[%s3546_s3 + $0x38] sm:$0xff] }
 0x153   :  { %v1904_v13 = vadd.s32 4294967294, %v851_v36  ;;  %v1138_v3 = vsel %vm1128_vm6, %v1135_v41, %v1137_v47  ;;  %v1141_v37 = vsel %vm1129_vm8, %v1123_v38, %v1140_v51  ;;  %v995_v6 = vshrl.u32 %v994_v0, 23 }
 0x154   :  { %v1142_v40 = vsel %vm1128_vm6, %v1139_v48, %v1141_v37  ;;  %v2933_v20 = vmul.u32.u64.low %v1143_v11, %v1138_v3  ;;  %v2934_v14 = vmul.u32.u64.high %v1143_v11, %v1138_v3, %v2933_v20  ;;  %v870_v33 = vsel %vm785_vm3, %v869_v49, %v2893_v21  ;;  %v88_v49 = vpop.permute.xlu0 %87 }
 0x155   :  { %vm1905_vm9 = vcmp.lt.s32.totalorder %v1904_v13, 0  ;;  %v2937_v28 = vmul.u32.u64.low %v1143_v11, %v1142_v40  ;;  %v2938_v44 = vmul.u32.u64.high %v1143_v11, %v1142_v40, %v2937_v28  ;;  %v1910_v30 = vadd.s32 4294967169, %v995_v6 }
 0x156   :  { %v854_v5 = vsel %vm1905_vm9, 0, %v1904_v13  ;;  %v1134_v62 = vsel %vm1128_vm6, %v1131_v9, %v1133_v19  ;;  %vm982_vm10 = vcmp.lt.s32.totalorder %v2891_v23, 2  ;;  %v991_v58 = vand.u32 2147483647, %v2896_v27 }
 0x157   :  { %v855_v15 = vsub.s32 32, %v854_v5  ;;  %v859_v10 = vsub.s32 4294967266, %v854_v5  ;;  %v1001_v32 = vadd.s32 1, %v1910_v30  ;;  %v132_v29 = vmul.f32 %v2636_v17, %v93_v25 }
 0x158   :  { %v856_v50 = vshll.u32 %v2907_v60, %v854_v5  ;;  %v1153_v18 = vadd.s32 1, %v2934_v14  ;;  %v872_v21 = vsel %vm2927_vm7, 0, %v870_v33  ;;  %v1150_v43 = vmul.u32 %v1143_v11, %v1134_v62 }
 0x159   :  { %v857_v12 = vshrl.u32 %v2899_v22, %v855_v15  ;;  %v860_v39 = vadd.s32 127, %v859_v10  ;;  %vm1152_vm14 = vc.u32 %v2938_v44, %v2933_v20  ;;  %vm1002_vm15 = vcmp.gt.s32.totalorder %v1001_v32, 0 }
 0x15a   :  { %v2040_v46 = vpop.eup %2039  ;;  %v1154_v60 = vsel %vm1152_vm14, %v1153_v18, %v2934_v14  ;;  %vm986_vm12 = vcmp.eq.s32.totalorder %v2891_v23, 2  ;;  %v1003_v0 = vsel %vm1002_vm15, %v1001_v32, 0  ;;  %vm983_vm11 = vcmp.eq.s32.totalorder %v2891_v23, 0 }
 0x15b   :  { %v2042_v56 = vpop.eup %2041  ;;  %v987_v26 = vxor.u32 2147483648, %v2040_v46  ;;  %v858_v53 = vor.u32 %v857_v12, %v856_v50  ;;  %v861_v35 = vshll.u32 %v860_v39, 23  ;;  %v1155_v22 = vadd.s32 %v1154_v60, %v1150_v43 }
 0x15c   :  { %v984_v38 = vxor.u32 2147483648, %v2042_v56  ;;  %v998_v11 = vand.u32 8388607, %v991_v58  ;;  %v876_v36 = vadd.s32 3, %v872_v21  ;;  %v1005_v41 = vand.u32 31, %v1003_v0 }
 0x15d   :  { %v988_v34 = vsel %vm986_vm12, %v987_v26, %v2042_v56  ;;  %v862_v4 = vor.u32 4788187, %v861_v35  ;;  %v1156_v42 = vadd.s32 536870912, %v1155_v22  ;;  %vm979_vm0 = vweird.f32 %v2585_v2 }
 0x15e   :  { %v985_v45 = vsel %vm983_vm11, %v2040_v46, %v984_v38  ;;  %v865_v13 = vcvt.s32.f32 %v858_v53  ;;  %v1006_v51 = vsub.s32 32, %v1005_v41  ;;  %v2968_v19 = vmul.f32 %v2636_v17, %v88_v49 }
 0x15f   :  { %v989_v57 = vsel %vm982_vm10, %v985_v45, %v988_v34  ;;  %v863_v48 = vand.u32 2147483647, %v862_v4  ;;  %v2965_v47 = vshrl.u32 %v1156_v42, 30  ;;  %v999_v6 = vor.u32 8388608, %v998_v11 }
 0x160   :  { %v990_v9 = vsel %vm979_vm0, nan, %v989_v57  ;;  %v2971_v40 = vadd.f32 %v2654_v54, %v132_v29  ;;  %v2973_v14 = vand.u32 3, %v876_v36  ;;  %v1004_v23 = vshrl.u32 %v1003_v0, 5 }
 0x161   :  { %v1846_v3 = vadd.f32 %v1830_v24, %v990_v9  ;;  %v866_v37 = vmul.f32 %v865_v13, %v863_v48  ;;  %v1158_v2 = vshll.u32 %v2965_v47, 30  ;;  %v1009_v25 = vshrl.u32 %v2085_v59, %v1006_v51 }
 0x162   :  { %v1012_v5 = vshrl.u32 %v2086_v61, %v1006_v51  ;;  %v1014_v28 = vshll.u32 %v2086_v61, %v1005_v41  ;;  %v1015_v30 = vshrl.u32 %v2087_v63, %v1006_v51  ;;  %v1008_v10 = vshll.u32 %v2084_v55, %v1005_v41 }
 0x163   :  { %1863 = vst.msk [vmem:[%s3547_s4 + $0x38] sm:$0xff] %vm1855_vm13, %v1846_v3  ;;  %v867_v17 = vxor.u32 2147483648, %v866_v37  ;;  %v2984_v15 = vsub.s32 %v1155_v22, %v1158_v2  ;;  %v1011_v33 = vshll.u32 %v2085_v59, %v1005_v41  ;;  %v1018_v62 = vshrl.u32 %v2088_v1, %v1006_v51 }
 0x164   :  { %v1016_v29 = vor.u32 %v1015_v30, %v1014_v28  ;;  %v1017_v50 = vshll.u32 %v2087_v63, %v1005_v41  ;;  %v2992_v12 = vshll.u32 %v999_v6, 8  ;;  %v1010_v46 = vor.u32 %v1009_v25, %v1008_v10 }
 0x165   :  { %v868_v32 = vsel %vm785_vm3, %v867_v17, %v866_v37  ;;  %v1161_v18 = vsub.s32 0, %v2984_v15  ;;  %v1013_v21 = vor.u32 %v1012_v5, %v1011_v33  ;;  %v1020_v56 = vshll.u32 %v2088_v1, %v1005_v41 }
 0x166   :  { %v871_v39 = vsel %vm2927_vm7, %v2657_v16, %v868_v32  ;;  %v1019_v43 = vor.u32 %v1018_v62, %v1017_v50  ;;  %v1021_v26 = vshrl.u32 %v2089_v8, %v1006_v51  ;;  %vm1097_vm1 = vcmp.lt.s32.totalorder %v2825_v7, 0 }
 0x167   :  { %2043 = vcosq.f32 %v871_v39  ;;  %v1915_v53 = vmin.u32 %v1161_v18, %v2984_v15  ;;  %v1007_v35 = vshrl.u32 %v2084_v55, %v1006_v51  ;;  %vm1026_vm2 = vcmp.lt.s32.totalorder %v1004_v23, 4 }
 0x168   :  { %2045 = vsinq.f32 %v871_v39  ;;  %v1022_v31 = vor.u32 %v1021_v26, %v1020_v56  ;;  %vm1023_vm3 = vcmp.lt.s32.totalorder %v1004_v23, 1  ;;  %v1028_v60 = vsel %vm1026_vm2, %v1016_v29, 2102212464 }
 0x169   :  { %v1306_v38 = vand.u32 2139095040, %v2971_v40  ;;  %v1163_v22 = vclz %v1915_v53  ;;  %vm1025_vm4 = vcmp.lt.s32.totalorder %v1004_v23, 3  ;;  %v1027_v0 = vsel %vm1023_vm3, %v1007_v35, %v1010_v46 }
 0x16a   :  { %v1031_v34 = vsel %vm1023_vm3, %v1010_v46, %v1013_v21  ;;  %v1029_v4 = vsel %vm1025_vm4, %v1013_v21, %v1028_v60  ;;  %v1032_v11 = vsel %vm1026_vm2, %v1019_v43, 920167782  ;;  %v1035_v49 = vsel %vm1023_vm3, %v1013_v21, %v1016_v29 }
 0x16b   :  { %v1036_v24 = vsel %vm1026_vm2, %v1022_v31, 1326507024  ;;  %vm879_vm5 = vcmp.eq.s32.totalorder %v2973_v14, 0  ;;  %v1916_v45 = vadd.s32 4294967294, %v1163_v22  ;;  %vm1024_vm7 = vcmp.lt.s32.totalorder %v1004_v23, 2 }
 0x16c   :  { %v1033_v36 = vsel %vm1025_vm4, %v1016_v29, %v1032_v11  ;;  %v1037_v42 = vsel %vm1025_vm4, %v1019_v43, %v1036_v24  ;;  %v1181_v41 = vsub.s32 4, %v2965_v47  ;;  %v1307_v13 = vshrl.u32 %v1306_v38, 23  ;;  %v1829_v43 = vld [vmem:[%s3546_s3 + $0x30] sm:$0xff] }
 0x16d   :  { %v1034_v57 = vsel %vm1024_vm7, %v1031_v34, %v1033_v36  ;;  %v1038_v48 = vsel %vm1024_vm7, %v1035_v49, %v1037_v42  ;;  %vm875_vm6 = vweird.f32 %v2657_v16  ;;  %vm1917_vm8 = vcmp.lt.s32.totalorder %v1916_v45, 0 }
 0x16e   :  { %v1030_v9 = vsel %vm1024_vm7, %v1027_v0, %v1029_v4  ;;  %v3008_v51 = vmul.u32.u64.low %v2992_v12, %v1038_v48  ;;  %v3009_v3 = vmul.u32.u64.high %v2992_v12, %v1038_v48, %v3008_v51  ;;  %v1166_v37 = vsel %vm1917_vm8, 0, %v1916_v45 }
 0x16f   :  { %v3012_v6 = vmul.u32.u64.low %v2992_v12, %v1034_v57  ;;  %v3013_v2 = vmul.u32.u64.high %v2992_v12, %v1034_v57, %v3012_v6  ;;  %v1922_v23 = vadd.s32 4294967169, %v1307_v13  ;;  %vm882_vm9 = vcmp.eq.s32.totalorder %v2973_v14, 2 }
 0x170   :  { %v1151_v25 = vadd.s32 %v2933_v20, %v2938_v44  ;;  %v1167_v17 = vsub.s32 32, %v1166_v37  ;;  %v1171_v5 = vsub.s32 4294967266, %v1166_v37  ;;  %v1182_v30 = vsel %vm1097_vm1, %v1181_v41, %v2965_v47 }
 0x171   :  { %v2044_v28 = vpop.eup %2043  ;;  %v1046_v10 = vmul.u32 %v2992_v12, %v1030_v9  ;;  %v1303_v33 = vand.u32 2147483647, %v2971_v40  ;;  %v1313_v62 = vadd.s32 1, %v1922_v23  ;;  %v1168_v50 = vshll.u32 %v2984_v15, %v1166_v37 }
 0x172   :  { %v2046_v32 = vpop.eup %2045  ;;  %v883_v29 = vxor.u32 2147483648, %v2044_v28  ;;  %v1169_v39 = vshrl.u32 %v1151_v25, %v1167_v17  ;;  %v1172_v18 = vadd.s32 127, %v1171_v5  ;;  %vm1048_vm10 = vc.u32 %v3009_v3, %v3012_v6 }
 0x173   :  { %v880_v46 = vxor.u32 2147483648, %v2046_v32  ;;  %v1049_v20 = vadd.s32 1, %v3013_v2  ;;  %vm1314_vm14 = vcmp.gt.s32.totalorder %v1313_v62, 0  ;;  %vm878_vm15 = vcmp.lt.s32.totalorder %v2973_v14, 2 }
 0x174   :  { %v884_v44 = vsel %vm882_vm9, %v883_v29, %v2046_v32  ;;  %v1170_v47 = vor.u32 %v1169_v39, %v1168_v50  ;;  %v1173_v12 = vshll.u32 %v1172_v18, 23  ;;  %v1315_v21 = vsel %vm1314_vm14, %v1313_v62, 0 }
 0x175   :  { %v881_v15 = vsel %vm879_vm5, %v2044_v28, %v880_v46  ;;  %v1050_v56 = vsel %vm1048_vm10, %v1049_v20, %v3013_v2  ;;  %v1317_v26 = vand.u32 31, %v1315_v21  ;;  %vm3039_vm12 = vcmp.le.f32.partialorder %v1095_v52, 0.7853982 }
 0x176   :  { %v885_v53 = vsel %vm878_vm15, %v881_v15, %v884_v44  ;;  %v1174_v31 = vor.u32 4788187, %v1173_v12  ;;  %v1051_v60 = vadd.s32 %v1050_v56, %v1046_v10  ;;  %v1184_v22 = vsel %vm3039_vm12, 0, %v1182_v30 }
 0x177   :  { %v886_v38 = vsel %vm875_vm6, nan, %v885_v53  ;;  %v1310_v14 = vand.u32 8388607, %v1303_v33  ;;  %v1318_v0 = vsub.s32 32, %v1317_v26  ;;  %v1177_v11 = vcvt.s32.f32 %v1170_v47 }
 0x178   :  { %v1845_v34 = vadd.f32 %v1829_v43, %v886_v38  ;;  %v1175_v4 = vand.u32 2147483647, %v1174_v31  ;;  %v1052_v49 = vadd.s32 536870912, %v1051_v60  ;;  %v1320_v52 = vshll.u32 %v2084_v55, %v1317_v26 }
 0x179   :  { %v1321_v24 = vshrl.u32 %v2085_v59, %v1318_v0  ;;  %v1324_v45 = vshrl.u32 %v2086_v61, %v1318_v0  ;;  %v1327_v16 = vshrl.u32 %v2087_v63, %v1318_v0  ;;  %v1323_v41 = vshll.u32 %v2085_v59, %v1317_v26 }
 0x17a   :  { %1862 = vst.msk [vmem:[%s3547_s4 + $0x30] sm:$0xff] %vm1855_vm13, %v1845_v34  ;;  %v1178_v36 = vmul.f32 %v1177_v11, %v1175_v4  ;;  %v1053_v42 = vshrl.u32 %v1052_v49, 30  ;;  %v1330_v57 = vshrl.u32 %v2088_v1, %v1318_v0  ;;  %v1188_v48 = vadd.s32 3, %v1184_v22 }
 0x17b   :  { %v1316_v13 = vshrl.u32 %v1315_v21, 5  ;;  %v1326_v9 = vshll.u32 %v2086_v61, %v1317_v26  ;;  %v1329_v51 = vshll.u32 %v2087_v63, %v1317_v26  ;;  %v1322_v23 = vor.u32 %v1321_v24, %v1320_v52 }
 0x17c   :  { %v1179_v37 = vxor.u32 2147483648, %v1178_v36  ;;  %v1054_v2 = vshll.u32 %v1053_v42, 30  ;;  %v1325_v25 = vor.u32 %v1324_v45, %v1323_v41  ;;  %v1332_v28 = vshll.u32 %v2088_v1, %v1317_v26 }
 0x17d   :  { %v1328_v17 = vor.u32 %v1327_v16, %v1326_v9  ;;  %v1331_v5 = vor.u32 %v1330_v57, %v1329_v51  ;;  %v1333_v30 = vshrl.u32 %v2089_v8, %v1318_v0  ;;  %v1311_v32 = vor.u32 8388608, %v1310_v14 }
 0x17e   :  { %v1180_v10 = vsel %vm1097_vm1, %v1179_v37, %v1178_v36  ;;  %v3065_v62 = vsub.s32 %v1051_v60, %v1054_v2  ;;  %v3069_v29 = vadd.f32 %v2654_v54, %v2968_v19  ;;  %v1319_v39 = vshrl.u32 %v2084_v55, %v1318_v0 }
 0x17f   :  { %v1183_v50 = vsel %vm3039_vm12, %v2825_v7, %v1180_v10  ;;  %v1334_v18 = vor.u32 %v1333_v30, %v1332_v28  ;;  %vm1335_vm11 = vcmp.lt.s32.totalorder %v1316_v13, 1  ;;  %vm1337_vm0 = vcmp.lt.s32.totalorder %v1316_v13, 3 }
 0x180   :  { %2047 = vcosq.f32 %v1183_v50  ;;  %v1057_v46 = vsub.s32 0, %v3065_v62  ;;  %vm1338_vm1 = vcmp.lt.s32.totalorder %v1316_v13, 4  ;;  %v1343_v44 = vsel %vm1335_vm11, %v1322_v23, %v1325_v25 }
 0x181   :  { %2049 = vsinq.f32 %v1183_v50  ;;  %v1340_v20 = vsel %vm1338_vm1, %v1328_v17, 2102212464  ;;  %v1344_v47 = vsel %vm1338_vm1, %v1331_v5, 920167782  ;;  %v1077_v19 = vsub.s32 4, %v1053_v42 }
 0x182   :  { %v1911_v54 = vmin.u32 %v1057_v46, %v3065_v62  ;;  %vm1336_vm2 = vcmp.lt.s32.totalorder %v1316_v13, 2  ;;  %v1345_v12 = vsel %vm1337_vm0, %v1328_v17, %v1344_v47  ;;  %v1347_v43 = vsel %vm1335_vm11, %v1325_v25, %v1328_v17 }
 0x183   :  { %v1346_v21 = vsel %vm1336_vm2, %v1343_v44, %v1345_v12  ;;  %v1348_v15 = vsel %vm1338_vm1, %v1334_v18, 1326507024  ;;  %v1351_v56 = vshll.u32 %v1311_v32, 8  ;;  %v1189_v26 = vand.u32 3, %v1188_v48  ;;  %v1832_v32 = vld [vmem:[%s3546_s3 + $0x48] sm:$0xff] }
 0x184   :  { %v1059_v53 = vclz %v1911_v54  ;;  %v1339_v35 = vsel %vm1335_vm11, %v1319_v39, %v1322_v23  ;;  %v1341_v31 = vsel %vm1337_vm0, %v1325_v25, %v1340_v20  ;;  %vm993_vm3 = vcmp.lt.s32.totalorder %v2896_v27, 0  ;;  %v3121_v18 = vld [vmem:[%s3544_s1] ss:$0 sm:$0xff] }
 0x185   :  { %v1349_v60 = vsel %vm1337_vm0, %v1331_v5, %v1348_v15  ;;  %v3085_v38 = vmul.u32.u64.low %v1351_v56, %v1346_v21  ;;  %v3086_v22 = vmul.u32.u64.high %v1351_v56, %v1346_v21, %v3085_v38  ;;  %vm3091_vm4 = vcmp.le.f32.partialorder %v991_v58, 0.7853982 }
 0x186   :  { %v1912_v0 = vadd.s32 4294967294, %v1059_v53  ;;  %v1078_v34 = vsel %vm993_vm3, %v1077_v19, %v1053_v42  ;;  %v1350_v4 = vsel %vm1336_vm2, %v1347_v43, %v1349_v60  ;;  %vm1187_vm5 = vweird.f32 %v2825_v7 }
 0x187   :  { %v1342_v11 = vsel %vm1336_vm2, %v1339_v35, %v1341_v31  ;;  %v3100_v49 = vmul.u32.u64.low %v1351_v56, %v1350_v4  ;;  %v3101_v52 = vmul.u32.u64.high %v1351_v56, %v1350_v4, %v3100_v49  ;;  %v1202_v24 = vand.u32 2139095040, %v3069_v29 }
 0x188   :  { %vm1190_vm7 = vcmp.lt.s32.totalorder %v1189_v26, 2  ;;  %vm1194_vm6 = vcmp.eq.s32.totalorder %v1189_v26, 2  ;;  %v1047_v58 = vadd.s32 %v3012_v6, %v3009_v3  ;;  %vm1913_vm8 = vcmp.lt.s32.totalorder %v1912_v0, 0  ;;  %v103_v6 = vpop.permute.xlu1 %102 }
 0x189   :  { %v1062_v45 = vsel %vm1913_vm8, 0, %v1912_v0  ;;  %v1080_v16 = vsel %vm3091_vm4, 0, %v1078_v34  ;;  %v1361_v36 = vadd.s32 1, %v3086_v22  ;;  %v1203_v42 = vshrl.u32 %v1202_v24, 23  ;;  %v3139_v0 = vld [vmem:[%s3545_s2] ss:$0 sm:$0xff] }
 0x18a   :  { %v2048_v41 = vpop.eup %2047  ;;  %v1063_v57 = vsub.s32 32, %v1062_v45  ;;  %v1067_v48 = vsub.s32 4294967266, %v1062_v45  ;;  %v1358_v13 = vmul.u32 %v1351_v56, %v1342_v11  ;;  %v1199_v9 = vand.u32 2147483647, %v3069_v29 }
 0x18b   :  { %v2050_v51 = vpop.eup %2049  ;;  %v1195_v37 = vxor.u32 2147483648, %v2048_v41  ;;  %v1064_v2 = vshll.u32 %v3065_v62, %v1062_v45  ;;  %vm1360_vm9 = vc.u32 %v3101_v52, %v3085_v38  ;;  %v1918_v3 = vadd.s32 4294967169, %v1203_v42 }
 0x18c   :  { %v1192_v23 = vxor.u32 2147483648, %v2050_v51  ;;  %v1065_v25 = vshrl.u32 %v1047_v58, %v1063_v57  ;;  %v1068_v17 = vadd.s32 127, %v1067_v48  ;;  %v1362_v5 = vsel %vm1360_vm9, %v1361_v36, %v3086_v22 }
 0x18d   :  { %vm1191_vm10 = vcmp.eq.s32.totalorder %v1189_v26, 0  ;;  %v1196_v28 = vsel %vm1194_vm6, %v1195_v37, %v2050_v51  ;;  %v1363_v30 = vadd.s32 %v1362_v5, %v1358_v13  ;;  %v1209_v10 = vadd.s32 1, %v1918_v3 }
 0x18e   :  { %v1193_v62 = vsel %vm1191_vm10, %v2048_v41, %v1192_v23  ;;  %v1066_v50 = vor.u32 %v1065_v25, %v1064_v2  ;;  %v1069_v39 = vshll.u32 %v1068_v17, 23  ;;  %v134_v46 = vmul.f32 %v3121_v18, %v103_v6 }
 0x18f   :  { %v1197_v20 = vsel %vm1190_vm7, %v1193_v62, %v1196_v28  ;;  %v1084_v44 = vadd.s32 3, %v1080_v16  ;;  %v1364_v47 = vadd.s32 536870912, %v1363_v30  ;;  %vm1210_vm14 = vcmp.gt.s32.totalorder %v1209_v10, 0 }
 0x190   :  { %v1198_v54 = vsel %vm1187_vm5, nan, %v1197_v20  ;;  %v1070_v19 = vor.u32 4788187, %v1069_v39  ;;  %v1206_v12 = vand.u32 8388607, %v1199_v9  ;;  %v1211_v21 = vsel %vm1210_vm14, %v1209_v10, 0 }
 0x191   :  { %v1848_v43 = vadd.f32 %v1832_v32, %v1198_v54  ;;  %v1365_v15 = vshrl.u32 %v1364_v47, 30  ;;  %v1213_v56 = vand.u32 31, %v1211_v21  ;;  %v1073_v35 = vcvt.s32.f32 %v1066_v50 }
 0x192   :  { %v1071_v53 = vand.u32 2147483647, %v1070_v19  ;;  %vm1305_vm15 = vcmp.lt.s32.totalorder %v2971_v40, 0  ;;  %v3134_v60 = vand.u32 3, %v1084_v44  ;;  %v1207_v22 = vor.u32 8388608, %v1206_v12 }
 0x193   :  { %1865 = vst.msk [vmem:[%s3547_s4 + $0x48] sm:$0xff] %vm1855_vm13, %v1848_v43  ;;  %v1366_v26 = vshll.u32 %v1365_v15, 30  ;;  %v1214_v7 = vsub.s32 32, %v1213_v56  ;;  %v3142_v34 = vadd.f32 %v3139_v0, %v134_v46  ;;  %v1359_v4 = vadd.s32 %v3085_v38, %v3101_v52 }
 0x194   :  { %v1074_v31 = vmul.f32 %v1073_v35, %v1071_v53  ;;  %v3148_v49 = vshrl.u32 %v1211_v21, 5  ;;  %v1216_v45 = vshll.u32 %v2084_v55, %v1213_v56  ;;  %v1219_v41 = vshll.u32 %v2085_v59, %v1213_v56 }
 0x195   :  { %v3146_v11 = vsub.s32 %v1363_v30, %v1366_v26  ;;  %v1217_v24 = vshrl.u32 %v2085_v59, %v1214_v7  ;;  %v1220_v16 = vshrl.u32 %v2086_v61, %v1214_v7  ;;  %v1223_v36 = vshrl.u32 %v2087_v63, %v1214_v7 }
 0x196   :  { %v1075_v58 = vxor.u32 2147483648, %v1074_v31  ;;  %v1222_v57 = vshll.u32 %v2086_v61, %v1213_v56  ;;  %v1226_v38 = vshrl.u32 %v2088_v1, %v1214_v7  ;;  %v1389_v48 = vsub.s32 4, %v1365_v15 }
 0x197   :  { %v1369_v42 = vsub.s32 0, %v3146_v11  ;;  %v1218_v13 = vor.u32 %v1217_v24, %v1216_v45  ;;  %v1225_v51 = vshll.u32 %v2087_v63, %v1213_v56  ;;  %v1221_v3 = vor.u32 %v1220_v16, %v1219_v41 }
 0x198   :  { %v1076_v52 = vsel %vm993_vm3, %v1075_v58, %v1074_v31  ;;  %v1224_v6 = vor.u32 %v1223_v36, %v1222_v57  ;;  %v1228_v25 = vshll.u32 %v2088_v1, %v1213_v56  ;;  %v1229_v17 = vshrl.u32 %v2089_v8, %v1214_v7 }
 0x199   :  { %v1079_v37 = vsel %vm3091_vm4, %v2896_v27, %v1076_v52  ;;  %v1923_v2 = vmin.u32 %v1369_v42, %v3146_v11  ;;  %v1227_v23 = vor.u32 %v1226_v38, %v1225_v51  ;;  %v3167_v28 = vshll.u32 %v1207_v22, 8 }
 0x19a   :  { %2051 = vcosq.f32 %v1079_v37  ;;  %v1514_v30 = vand.u32 2139095040, %v3142_v34  ;;  %v3172_v14 = vsel %vm1305_vm15, %v1389_v48, %v1365_v15  ;;  %v1215_v10 = vshrl.u32 %v2084_v55, %v1214_v7 }
 0x19b   :  { %2053 = vsinq.f32 %v1079_v37  ;;  %v1371_v5 = vclz %v1923_v2  ;;  %v1230_v32 = vor.u32 %v1229_v17, %v1228_v25  ;;  %vm1231_vm12 = vcmp.lt.s32.totalorder %v3148_v49, 1 }
 0x19c   :  { %vm3178_vm11 = vcmp.le.f32.partialorder %v1303_v33, 0.7853982  ;;  %vm1233_vm0 = vcmp.lt.s32.totalorder %v3148_v49, 3  ;;  %vm1234_vm1 = vcmp.lt.s32.totalorder %v3148_v49, 4  ;;  %v1239_v39 = vsel %vm1231_vm12, %v1218_v13, %v1221_v3 }
 0x19d   :  { %v1924_v50 = vadd.s32 4294967294, %v1371_v5  ;;  %v1236_v46 = vsel %vm1234_vm1, %v1224_v6, 2102212464  ;;  %v1240_v20 = vsel %vm1234_vm1, %v1227_v23, 920167782  ;;  %v1243_v44 = vsel %vm1231_vm12, %v1221_v3, %v1224_v6 }
 0x19e   :  { %v1244_v47 = vsel %vm1234_vm1, %v1230_v32, 1326507024  ;;  %vm1232_vm3 = vcmp.lt.s32.totalorder %v3148_v49, 2  ;;  %v1241_v54 = vsel %vm1233_vm0, %v1224_v6, %v1240_v20  ;;  %v1235_v12 = vsel %vm1231_vm12, %v1215_v10, %v1218_v13  ;;  %v1831_v6 = vld [vmem:[%s3546_s3 + $0x40] sm:$0xff] }
 0x19f   :  { %vm1925_vm2 = vcmp.lt.s32.totalorder %v1924_v50, 0  ;;  %v1245_v33 = vsel %vm1233_vm0, %v1227_v23, %v1244_v47  ;;  %v1242_v21 = vsel %vm1232_vm3, %v1239_v39, %v1241_v54  ;;  %vm1083_vm4 = vweird.f32 %v2896_v27 }
 0x1a0   :  { %v1374_v19 = vsel %vm1925_vm2, 0, %v1924_v50  ;;  %v1246_v43 = vsel %vm1232_vm3, %v1243_v44, %v1245_v33  ;;  %v1237_v53 = vsel %vm1233_vm0, %v1221_v3, %v1236_v46  ;;  %v1515_v35 = vshrl.u32 %v1514_v30, 23 }
 0x1a1   :  { %v1375_v15 = vsub.s32 32, %v1374_v19  ;;  %v1379_v56 = vsub.s32 4294967266, %v1374_v19  ;;  %v3197_v26 = vmul.u32.u64.low %v3167_v28, %v1246_v43  ;;  %v3198_v7 = vmul.u32.u64.high %v3167_v28, %v1246_v43, %v3197_v26 }
 0x1a2   :  { %v3201_v31 = vmul.u32.u64.low %v3167_v28, %v1242_v21  ;;  %v3202_v22 = vmul.u32.u64.high %v3167_v28, %v1242_v21, %v3201_v31  ;;  %v1376_v24 = vshll.u32 %v3146_v11, %v1374_v19  ;;  %v1930_v16 = vadd.s32 4294967169, %v1515_v35  ;;  %v98_v11 = vpop.permute.xlu0 %97 }
 0x1a3   :  { %v1377_v58 = vshrl.u32 %v1359_v4, %v1375_v15  ;;  %v1380_v45 = vadd.s32 127, %v1379_v56  ;;  %vm1086_vm5 = vcmp.lt.s32.totalorder %v3134_v60, 2  ;;  %vm1087_vm7 = vcmp.eq.s32.totalorder %v3134_v60, 0 }
 0x1a4   :  { %v2052_v36 = vpop.eup %2051  ;;  %vm1090_vm6 = vcmp.eq.s32.totalorder %v3134_v60, 2  ;;  %v1238_v42 = vsel %vm1232_vm3, %v1235_v12, %v1237_v53  ;;  %v1511_v48 = vand.u32 2147483647, %v3142_v34  ;;  %v1392_v13 = vsel %vm3178_vm11, 0, %v3172_v14 }
 0x1a5   :  { %v2054_v41 = vpop.eup %2053  ;;  %v1091_v57 = vxor.u32 2147483648, %v2052_v36  ;;  %v1378_v38 = vor.u32 %v1377_v58, %v1376_v24  ;;  %v1381_v52 = vshll.u32 %v1380_v45, 23  ;;  %vm1256_vm8 = vc.u32 %v3198_v7, %v3201_v31 }
 0x1a6   :  { %v1088_v4 = vxor.u32 2147483648, %v2054_v41  ;;  %v1257_v51 = vadd.s32 1, %v3202_v22  ;;  %v1254_v2 = vmul.u32 %v3167_v28, %v1238_v42  ;;  %v1521_v3 = vadd.s32 1, %v1930_v16 }
 0x1a7   :  { %v1092_v37 = vsel %vm1090_vm6, %v1091_v57, %v2054_v41  ;;  %v1382_v49 = vor.u32 4788187, %v1381_v52  ;;  %v1385_v25 = vcvt.s32.f32 %v1378_v38  ;;  %v133_v5 = vmul.f32 %v3121_v18, %v98_v11 }
 0x1a8   :  { %v1089_v23 = vsel %vm1087_vm7, %v2052_v36, %v1088_v4  ;;  %v1258_v17 = vsel %vm1256_vm8, %v1257_v51, %v3202_v22  ;;  %vm1522_vm9 = vcmp.gt.s32.totalorder %v1521_v3, 0  ;;  %v1396_v32 = vadd.s32 3, %v1392_v13 }
 0x1a9   :  { %v1093_v30 = vsel %vm1086_vm5, %v1089_v23, %v1092_v37  ;;  %v1383_v14 = vand.u32 2147483647, %v1382_v49  ;;  %v1259_v10 = vadd.s32 %v1258_v17, %v1254_v2  ;;  %v1518_v50 = vand.u32 8388607, %v1511_v48 }
 0x1aa   :  { %v1094_v28 = vsel %vm1083_vm4, nan, %v1093_v30  ;;  %v1523_v39 = vsel %vm1522_vm9, %v1521_v3, 0  ;;  %v3238_v33 = vand.u32 3, %v1396_v32  ;;  %v3241_v12 = vadd.f32 %v3139_v0, %v133_v5 }
 0x1ab   :  { %v1847_v46 = vadd.f32 %v1831_v6, %v1094_v28  ;;  %v1386_v20 = vmul.f32 %v1385_v25, %v1383_v14  ;;  %v1260_v44 = vadd.s32 536870912, %v1259_v10  ;;  %v1525_v47 = vand.u32 31, %v1523_v39 }
 0x1ac   :  { %v1519_v27 = vor.u32 8388608, %v1518_v50  ;;  %v1524_v15 = vshrl.u32 %v1523_v39, 5  ;;  %v1255_v16 = vadd.s32 %v3201_v31, %v3198_v7  ;;  %v1410_v13 = vand.u32 2139095040, %v3241_v12 }
 0x1ad   :  { %1864 = vst.msk [vmem:[%s3547_s4 + $0x40] sm:$0xff] %vm1855_vm13, %v1847_v46  ;;  %v1387_v60 = vxor.u32 2147483648, %v1386_v20  ;;  %v3236_v54 = vshrl.u32 %v1260_v44, 30  ;;  %v1526_v19 = vsub.s32 32, %v1525_v47  ;;  %v1528_v56 = vshll.u32 %v2084_v55, %v1525_v47 }
 0x1ae   :  { %v1531_v26 = vshll.u32 %v2085_v59, %v1525_v47  ;;  %v1534_v58 = vshll.u32 %v2086_v61, %v1525_v47  ;;  %v1537_v62 = vshll.u32 %v2087_v63, %v1525_v47  ;;  %v1540_v52 = vshll.u32 %v2088_v1, %v1525_v47 }
 0x1af   :  { %v1388_v21 = vsel %vm1305_vm15, %v1387_v60, %v1386_v20  ;;  %v1262_v43 = vshll.u32 %v3236_v54, 30  ;;  %v1529_v35 = vshrl.u32 %v2085_v59, %v1526_v19  ;;  %v1532_v22 = vshrl.u32 %v2086_v61, %v1526_v19 }
 0x1b0   :  { %v1391_v53 = vsel %vm3178_vm11, %v2971_v40, %v1388_v21  ;;  %v1535_v45 = vshrl.u32 %v2087_v63, %v1526_v19  ;;  %v1538_v38 = vshrl.u32 %v2088_v1, %v1526_v19  ;;  %v1541_v11 = vshrl.u32 %v2089_v8, %v1526_v19 }
 0x1b1   :  { %2055 = vcosq.f32 %v1391_v53  ;;  %v3253_v24 = vsub.s32 %v1259_v10, %v1262_v43  ;;  %v1530_v36 = vor.u32 %v1529_v35, %v1528_v56  ;;  %v1533_v41 = vor.u32 %v1532_v22, %v1531_v26 }
 0x1b2   :  { %2057 = vsinq.f32 %v1391_v53  ;;  %v1536_v57 = vor.u32 %v1535_v45, %v1534_v58  ;;  %v3264_v4 = vshll.u32 %v1519_v27, 8  ;;  %vm1402_vm10 = vcmp.eq.s32.totalorder %v3238_v33, 2 }
 0x1b3   :  { %v1265_v42 = vsub.s32 0, %v3253_v24  ;;  %vm1201_vm14 = vcmp.lt.s32.totalorder %v3069_v29, 0  ;;  %v1527_v31 = vshrl.u32 %v2084_v55, %v1526_v19  ;;  %v1539_v51 = vor.u32 %v1538_v38, %v1537_v62  ;;  %v1834_v62 = vld [vmem:[%s3546_s3 + $0x58] sm:$0xff] }
 0x1b4   :  { %vm1546_vm15 = vcmp.lt.s32.totalorder %v1524_v15, 4  ;;  %vm1399_vm12 = vcmp.eq.s32.totalorder %v3238_v33, 0  ;;  %v1542_v37 = vor.u32 %v1541_v11, %v1540_v52  ;;  %vm1543_vm11 = vcmp.lt.s32.totalorder %v1524_v15, 1 }
 0x1b5   :  { %v1919_v7 = vmin.u32 %v1265_v42, %v3253_v24  ;;  %vm1545_vm0 = vcmp.lt.s32.totalorder %v1524_v15, 3  ;;  %v1548_v49 = vsel %vm1546_vm15, %v1536_v57, 2102212464  ;;  %vm1398_vm1 = vcmp.lt.s32.totalorder %v3238_v33, 2 }
 0x1b6   :  { %v1547_v3 = vsel %vm1543_vm11, %v1527_v31, %v1530_v36  ;;  %v1551_v6 = vsel %vm1543_vm11, %v1530_v36, %v1533_v41  ;;  %v1555_v23 = vsel %vm1543_vm11, %v1533_v41, %v1536_v57  ;;  %vm1395_vm2 = vweird.f32 %v2971_v40  ;;  %v113_v31 = vpop.permute.xlu1 %112 }
 0x1b7   :  { %v1267_v2 = vclz %v1919_v7  ;;  %v1549_v25 = vsel %vm1545_vm0, %v1533_v41, %v1548_v49  ;;  %v1552_v17 = vsel %vm1546_vm15, %v1539_v51, 920167782  ;;  %v1556_v5 = vsel %vm1546_vm15, %v1542_v37, 1326507024 }
 0x1b8   :  { %v1411_v30 = vshrl.u32 %v1410_v13, 23  ;;  %vm1544_vm3 = vcmp.lt.s32.totalorder %v1524_v15, 2  ;;  %v1553_v10 = vsel %vm1545_vm0, %v1536_v57, %v1552_v17  ;;  %v1557_v28 = vsel %vm1545_vm0, %v1539_v51, %v1556_v5 }
 0x1b9   :  { %v1920_v14 = vadd.s32 4294967294, %v1267_v2  ;;  %v1285_v32 = vsub.s32 4, %v3236_v54  ;;  %v1554_v50 = vsel %vm1544_vm3, %v1551_v6, %v1553_v10  ;;  %v1558_v39 = vsel %vm1544_vm3, %v1555_v23, %v1557_v28 }
 0x1ba   :  { %v1926_v46 = vadd.s32 4294967169, %v1411_v30  ;;  %v1550_v44 = vsel %vm1544_vm3, %v1547_v3, %v1549_v25  ;;  %v3276_v47 = vmul.u32.u64.low %v3264_v4, %v1558_v39  ;;  %v3277_v60 = vmul.u32.u64.high %v3264_v4, %v1558_v39, %v3276_v47 }
 0x1bb   :  { %v2056_v20 = vpop.eup %2055  ;;  %vm1921_vm4 = vcmp.lt.s32.totalorder %v1920_v14, 0  ;;  %v3280_v43 = vmul.u32.u64.low %v3264_v4, %v1554_v50  ;;  %v3281_v15 = vmul.u32.u64.high %v3264_v4, %v1554_v50, %v3280_v43  ;;  %v1407_v26 = vand.u32 2147483647, %v3241_v12 }
 0x1bc   :  { %v2058_v27 = vpop.eup %2057  ;;  %v1403_v19 = vxor.u32 2147483648, %v2056_v20  ;;  %v1270_v21 = vsel %vm1921_vm4, 0, %v1920_v14  ;;  %v1286_v58 = vsel %vm1201_vm14, %v1285_v32, %v3236_v54  ;;  %v1566_v45 = vmul.u32 %v3264_v4, %v1550_v44 }
 0x1bd   :  { %v1400_v56 = vxor.u32 2147483648, %v2058_v27  ;;  %v1271_v53 = vsub.s32 32, %v1270_v21  ;;  %v1275_v35 = vsub.s32 4294967266, %v1270_v21  ;;  %v1417_v36 = vadd.s32 1, %v1926_v46 }
 0x1be   :  { %v1404_v22 = vsel %vm1402_vm10, %v1403_v19, %v2058_v27  ;;  %v1272_v41 = vshll.u32 %v3253_v24, %v1270_v21  ;;  %vm1568_vm5 = vc.u32 %v3277_v60, %v3280_v43  ;;  %v1569_v54 = vadd.s32 1, %v3281_v15 }
 0x1bf   :  { %v1401_v42 = vsel %vm1399_vm12, %v2056_v20, %v1400_v56  ;;  %v1273_v57 = vshrl.u32 %v1255_v16, %v1271_v53  ;;  %v1276_v38 = vadd.s32 127, %v1275_v35  ;;  %vm1418_vm7 = vcmp.gt.s32.totalorder %v1417_v36, 0 }
 0x1c0   :  { %v1405_v52 = vsel %vm1398_vm1, %v1401_v42, %v1404_v22  ;;  %v1419_v7 = vsel %vm1418_vm7, %v1417_v36, 0  ;;  %v1570_v24 = vsel %vm1568_vm5, %v1569_v54, %v3281_v15  ;;  %vm3307_vm6 = vcmp.le.f32.partialorder %v1199_v9, 0.7853982 }
 0x1c1   :  { %v1406_v11 = vsel %vm1395_vm2, nan, %v1405_v52  ;;  %v1274_v4 = vor.u32 %v1273_v57, %v1272_v41  ;;  %v1277_v13 = vshll.u32 %v1276_v38, 23  ;;  %v1421_v16 = vand.u32 31, %v1419_v7 }
 0x1c2   :  { %v1850_v51 = vadd.f32 %v1834_v62, %v1406_v11  ;;  %v1571_v49 = vadd.s32 %v1570_v24, %v1566_v45  ;;  %v1288_v40 = vsel %vm3307_vm6, 0, %v1286_v58  ;;  %v1414_v2 = vand.u32 8388607, %v1407_v26 }
 0x1c3   :  { %v1278_v37 = vor.u32 4788187, %v1277_v13  ;;  %v1422_v3 = vsub.s32 32, %v1421_v16  ;;  %v136_v6 = vmul.f32 %v3121_v18, %v113_v31  ;;  %v1281_v23 = vcvt.s32.f32 %v1274_v4 }
 0x1c4   :  { %1867 = vst.msk [vmem:[%s3547_s4 + $0x58] sm:$0xff] %vm1855_vm13, %v1850_v51  ;;  %v1572_v25 = vadd.s32 536870912, %v1571_v49  ;;  %v1424_v17 = vshll.u32 %v2084_v55, %v1421_v16  ;;  %v1427_v30 = vshll.u32 %v2085_v59, %v1421_v16  ;;  %v1420_v46 = vshrl.u32 %v1419_v7, 5 }
 0x1c5   :  { %v1279_v9 = vand.u32 2147483647, %v1278_v37  ;;  %v1425_v5 = vshrl.u32 %v2085_v59, %v1422_v3  ;;  %v1428_v14 = vshrl.u32 %v2086_v61, %v1422_v3  ;;  %v1431_v10 = vshrl.u32 %v2087_v63, %v1422_v3 }
 0x1c6   :  { %v1573_v32 = vshrl.u32 %v1572_v25, 30  ;;  %v1434_v50 = vshrl.u32 %v2088_v1, %v1422_v3  ;;  %v1437_v39 = vshrl.u32 %v2089_v8, %v1422_v3  ;;  %v1430_v20 = vshll.u32 %v2086_v61, %v1421_v16 }
 0x1c7   :  { %v1282_v28 = vmul.f32 %v1281_v23, %v1279_v9  ;;  %v1433_v44 = vshll.u32 %v2087_v63, %v1421_v16  ;;  %v1436_v47 = vshll.u32 %v2088_v1, %v1421_v16  ;;  %v1426_v21 = vor.u32 %v1425_v5, %v1424_v17  ;;  %v108_v9 = vpop.permute.xlu0 %107 }
 0x1c8   :  { %v1574_v19 = vshll.u32 %v1573_v32, 30  ;;  %v1429_v15 = vor.u32 %v1428_v14, %v1427_v30  ;;  %v1292_v56 = vadd.s32 3, %v1288_v40  ;;  %v1415_v53 = vor.u32 8388608, %v1414_v2 }
 0x1c9   :  { %v1283_v27 = vxor.u32 2147483648, %v1282_v28  ;;  %v1432_v35 = vor.u32 %v1431_v10, %v1430_v20  ;;  %v1435_v22 = vor.u32 %v1434_v50, %v1433_v44  ;;  %v1438_v36 = vor.u32 %v1437_v39, %v1436_v47 }
 0x1ca   :  { %v3332_v45 = vsub.s32 %v1571_v49, %v1574_v19  ;;  %v3335_v62 = vadd.f32 %v3139_v0, %v136_v6  ;;  %v1423_v41 = vshrl.u32 %v2084_v55, %v1422_v3  ;;  %vm1439_vm8 = vcmp.lt.s32.totalorder %v1420_v46, 1 }
 0x1cb   :  { %v1284_v58 = vsel %vm1201_vm14, %v1283_v27, %v1282_v28  ;;  %vm1440_vm9 = vcmp.lt.s32.totalorder %v1420_v46, 2  ;;  %vm1442_vm10 = vcmp.lt.s32.totalorder %v1420_v46, 4  ;;  %v1447_v38 = vsel %vm1439_vm8, %v1426_v21, %v1429_v15 }
 0x1cc   :  { %v1287_v42 = vsel %vm3307_vm6, %v3069_v29, %v1284_v58  ;;  %v1577_v57 = vsub.s32 0, %v3332_v45  ;;  %vm1441_vm14 = vcmp.lt.s32.totalorder %v1420_v46, 3  ;;  %v1444_v52 = vsel %vm1442_vm10, %v1432_v35, 2102212464 }
 0x1cd   :  { %2059 = vcosq.f32 %v1287_v42  ;;  %v1448_v54 = vsel %vm1442_vm10, %v1435_v22, 920167782  ;;  %v1451_v13 = vsel %vm1439_vm8, %v1429_v15, %v1432_v35  ;;  %v1452_v7 = vsel %vm1442_vm10, %v1438_v36, 1326507024 }
 0x1ce   :  { %2061 = vsinq.f32 %v1287_v42  ;;  %v1931_v11 = vmin.u32 %v1577_v57, %v3332_v45  ;;  %v1449_v4 = vsel %vm1441_vm14, %v1432_v35, %v1448_v54  ;;  %v1597_v31 = vsub.s32 4, %v1573_v32  ;;  %v1833_v42 = vld [vmem:[%s3546_s3 + $0x50] sm:$0xff] }
 0x1cf   :  { %v1450_v51 = vsel %vm1440_vm9, %v1447_v38, %v1449_v4  ;;  %v1453_v24 = vsel %vm1441_vm14, %v1435_v22, %v1452_v7  ;;  %v1455_v16 = vshll.u32 %v1415_v53, 8  ;;  %v1293_v33 = vand.u32 3, %v1292_v56 }
 0x1d0   :  { %v1579_v37 = vclz %v1931_v11  ;;  %v1443_v49 = vsel %vm1439_vm8, %v1423_v41, %v1426_v21  ;;  %v1445_v40 = vsel %vm1441_vm14, %v1429_v15, %v1444_v52  ;;  %vm1513_vm15 = vcmp.lt.s32.totalorder %v3142_v34, 0 }
 0x1d1   :  { %v1454_v2 = vsel %vm1440_vm9, %v1451_v13, %v1453_v24  ;;  %v3349_v3 = vmul.u32.u64.low %v1455_v16, %v1450_v51  ;;  %v3350_v6 = vmul.u32.u64.high %v1455_v16, %v1450_v51, %v3349_v3  ;;  %v1722_v5 = vand.u32 2139095040, %v3335_v62 }
 0x1d2   :  { %v1932_v23 = vadd.s32 4294967294, %v1579_v37  ;;  %v3353_v25 = vmul.u32.u64.low %v1455_v16, %v1454_v2  ;;  %v3354_v17 = vmul.u32.u64.high %v1455_v16, %v1454_v2, %v3353_v25  ;;  %vm1291_vm12 = vweird.f32 %v3069_v29 }
 0x1d3   :  { %vm3360_vm11 = vcmp.le.f32.partialorder %v1511_v48, 0.7853982  ;;  %v1598_v14 = vsel %vm1513_vm15, %v1597_v31, %v1573_v32  ;;  %v1446_v10 = vsel %vm1440_vm9, %v1443_v49, %v1445_v40  ;;  %vm1298_vm0 = vcmp.eq.s32.totalorder %v1293_v33, 2 }
 0x1d4   :  { %vm1933_vm1 = vcmp.lt.s32.totalorder %v1932_v23, 0  ;;  %v1723_v28 = vshrl.u32 %v1722_v5, 23  ;;  %v135_v50 = vmul.f32 %v3121_v18, %v108_v9  ;;  %v1567_v39 = vadd.s32 %v3280_v43, %v3277_v60 }
 0x1d5   :  { %v1582_v20 = vsel %vm1933_vm1, 0, %v1932_v23  ;;  %v1465_v44 = vadd.s32 1, %v3350_v6  ;;  %v1719_v48 = vand.u32 2147483647, %v3335_v62  ;;  %v1600_v32 = vsel %vm3360_vm11, 0, %v1598_v14 }
 0x1d6   :  { %v1583_v27 = vsub.s32 32, %v1582_v20  ;;  %v1587_v19 = vsub.s32 4294967266, %v1582_v20  ;;  %v1462_v46 = vmul.u32 %v1455_v16, %v1446_v10  ;;  %v1584_v56 = vshll.u32 %v3332_v45, %v1582_v20 }
 0x1d7   :  { %v2060_v47 = vpop.eup %2059  ;;  %vm1464_vm2 = vc.u32 %v3354_v17, %v3349_v3  ;;  %v1938_v18 = vadd.s32 4294967169, %v1723_v28  ;;  %vm1295_vm3 = vcmp.eq.s32.totalorder %v1293_v33, 0  ;;  %vm1294_vm4 = vcmp.lt.s32.totalorder %v1293_v33, 2 }
 0x1d8   :  { %v2062_v21 = vpop.eup %2061  ;;  %v1299_v15 = vxor.u32 2147483648, %v2060_v47  ;;  %v1585_v43 = vshrl.u32 %v1567_v39, %v1583_v27  ;;  %v1588_v53 = vadd.s32 127, %v1587_v19  ;;  %v1466_v35 = vsel %vm1464_vm2, %v1465_v44, %v3350_v6 }
 0x1d9   :  { %v1296_v60 = vxor.u32 2147483648, %v2062_v21  ;;  %v1467_v58 = vadd.s32 %v1466_v35, %v1462_v46  ;;  %v1729_v36 = vadd.s32 1, %v1938_v18  ;;  %v1604_v52 = vadd.s32 3, %v1600_v32 }
 0x1da   :  { %v1300_v22 = vsel %vm1298_vm0, %v1299_v15, %v2062_v21  ;;  %v1586_v41 = vor.u32 %v1585_v43, %v1584_v56  ;;  %v1589_v57 = vshll.u32 %v1588_v53, 23  ;;  %v1726_v13 = vand.u32 8388607, %v1719_v48 }
 0x1db   :  { %v1297_v45 = vsel %vm1295_vm3, %v2060_v47, %v1296_v60  ;;  %v1468_v54 = vadd.s32 536870912, %v1467_v58  ;;  %vm1730_vm5 = vcmp.gt.s32.totalorder %v1729_v36, 0  ;;  %v3389_v16 = vadd.f32 %v3139_v0, %v135_v50 }
 0x1dc   :  { %v1301_v38 = vsel %vm1294_vm4, %v1297_v45, %v1300_v22  ;;  %v1590_v4 = vor.u32 4788187, %v1589_v57  ;;  %v1731_v7 = vsel %vm1730_vm5, %v1729_v36, 0  ;;  %v1593_v37 = vcvt.s32.f32 %v1586_v41 }
 0x1dd   :  { %v1302_v11 = vsel %vm1291_vm12, nan, %v1301_v38  ;;  %v3386_v51 = vshrl.u32 %v1468_v54, 30  ;;  %v1733_v24 = vand.u32 31, %v1731_v7  ;;  %v3396_v2 = vand.u32 3, %v1604_v52 }
 0x1de   :  { %v1849_v31 = vadd.f32 %v1833_v42, %v1302_v11  ;;  %v1591_v33 = vand.u32 2147483647, %v1590_v4  ;;  %v1727_v9 = vor.u32 8388608, %v1726_v13  ;;  %v1618_v0 = vand.u32 2139095040, %v3389_v16 }
 0x1df   :  { %v1470_v29 = vshll.u32 %v3386_v51, 30  ;;  %v1734_v49 = vsub.s32 32, %v1733_v24  ;;  %v1736_v5 = vshll.u32 %v2084_v55, %v1733_v24  ;;  %v1739_v50 = vshll.u32 %v2085_v59, %v1733_v24 }
 0x1e0   :  { %1866 = vst.msk [vmem:[%s3547_s4 + $0x50] sm:$0xff] %vm1855_vm13, %v1849_v31  ;;  %v1594_v40 = vmul.f32 %v1593_v37, %v1591_v33  ;;  %v1742_v39 = vshll.u32 %v2086_v61, %v1733_v24  ;;  %v1732_v47 = vshrl.u32 %v1731_v7, 5  ;;  %v1745_v19 = vshll.u32 %v2087_v63, %v1733_v24 }
 0x1e1   :  { %v3398_v6 = vsub.s32 %v1467_v58, %v1470_v29  ;;  %v1737_v23 = vshrl.u32 %v2085_v59, %v1734_v49  ;;  %v1740_v14 = vshrl.u32 %v2086_v61, %v1734_v49  ;;  %v1743_v10 = vshrl.u32 %v2087_v63, %v1734_v49 }
 0x1e2   :  { %v1595_v25 = vxor.u32 2147483648, %v1594_v40  ;;  %v1746_v20 = vshrl.u32 %v2088_v1, %v1734_v49  ;;  %v1748_v18 = vshll.u32 %v2088_v1, %v1733_v24  ;;  %v1749_v60 = vshrl.u32 %v2089_v8, %v1734_v49 }
 0x1e3   :  { %v1473_v28 = vsub.s32 0, %v3398_v6  ;;  %v1738_v27 = vor.u32 %v1737_v23, %v1736_v5  ;;  %v1741_v21 = vor.u32 %v1740_v14, %v1739_v50  ;;  %v1744_v15 = vor.u32 %v1743_v10, %v1742_v39 }
 0x1e4   :  { %v1596_v44 = vsel %vm1513_vm15, %v1595_v25, %v1594_v40  ;;  %v1747_v56 = vor.u32 %v1746_v20, %v1745_v19  ;;  %v1463_v43 = vadd.s32 %v3349_v3, %v3354_v17  ;;  %v1767_v35 = vshll.u32 %v1727_v9, 8 }
 0x1e5   :  { %v1599_v32 = vsel %vm3360_vm11, %v3142_v34, %v1596_v44  ;;  %v1927_v46 = vmin.u32 %v1473_v28, %v3398_v6  ;;  %v1735_v22 = vshrl.u32 %v2084_v55, %v1734_v49  ;;  %v1750_v30 = vor.u32 %v1749_v60, %v1748_v18 }
 0x1e6   :  { %2063 = vcosq.f32 %v1599_v32  ;;  %vm1751_vm7 = vcmp.lt.s32.totalorder %v1732_v47, 1  ;;  %v1619_v58 = vshrl.u32 %v1618_v0, 23  ;;  %vm1753_vm6 = vcmp.lt.s32.totalorder %v1732_v47, 3 }
 0x1e7   :  { %2065 = vsinq.f32 %v1599_v32  ;;  %v1475_v53 = vclz %v1927_v46  ;;  %vm1754_vm8 = vcmp.lt.s32.totalorder %v1732_v47, 4  ;;  %v1759_v42 = vsel %vm1751_vm7, %v1738_v27, %v1741_v21 }
 0x1e8   :  { %v1756_v45 = vsel %vm1754_vm8, %v1744_v15, 2102212464  ;;  %v1760_v41 = vsel %vm1754_vm8, %v1747_v56, 920167782  ;;  %v1763_v57 = vsel %vm1751_vm7, %v1741_v21, %v1744_v15  ;;  %v1764_v38 = vsel %vm1754_vm8, %v1750_v30, 1326507024 }
 0x1e9   :  { %v1928_v36 = vadd.s32 4294967294, %v1475_v53  ;;  %vm1752_vm10 = vcmp.lt.s32.totalorder %v1732_v47, 2  ;;  %v1761_v52 = vsel %vm1753_vm6, %v1744_v15, %v1760_v41  ;;  %v1765_v3 = vsel %vm1753_vm6, %v1747_v56, %v1764_v38 }
 0x1ea   :  { %v1755_v54 = vsel %vm1751_vm7, %v1735_v22, %v1738_v27  ;;  %v1762_v11 = vsel %vm1752_vm10, %v1759_v42, %v1761_v52  ;;  %v1766_v4 = vsel %vm1752_vm10, %v1763_v57, %v1765_v3  ;;  %vm1603_vm14 = vweird.f32 %v3142_v34 }
 0x1eb   :  { %vm1929_vm9 = vcmp.lt.s32.totalorder %v1928_v36, 0  ;;  %v1757_v31 = vsel %vm1753_vm6, %v1741_v21, %v1756_v45  ;;  %v1934_v24 = vadd.s32 4294967169, %v1619_v58  ;;  %vm1607_vm15 = vcmp.eq.s32.totalorder %v3396_v2, 0 }
 0x1ec   :  { %v1478_v17 = vsel %vm1929_vm9, 0, %v1928_v36  ;;  %v3427_v33 = vmul.u32.u64.low %v1767_v35, %v1766_v4  ;;  %v3428_v37 = vmul.u32.u64.high %v1767_v35, %v1766_v4, %v3427_v33  ;;  %vm1610_vm12 = vcmp.eq.s32.totalorder %v3396_v2, 2 }
 0x1ed   :  { %v1479_v13 = vsub.s32 32, %v1478_v17  ;;  %v1483_v7 = vsub.s32 4294967266, %v1478_v17  ;;  %v3430_v29 = vmul.u32.u64.low %v1767_v35, %v1762_v11  ;;  %v3431_v49 = vmul.u32.u64.high %v1767_v35, %v1762_v11, %v3430_v29 }
 0x1ee   :  { %v1480_v40 = vshll.u32 %v3398_v6, %v1478_v17  ;;  %v1625_v0 = vadd.s32 1, %v1934_v24  ;;  %v1758_v5 = vsel %vm1752_vm10, %v1755_v54, %v1757_v31  ;;  %v1615_v14 = vand.u32 2147483647, %v3389_v16 }
 0x1ef   :  { %v1481_v9 = vshrl.u32 %v1463_v43, %v1479_v13  ;;  %v1484_v23 = vadd.s32 127, %v1483_v7  ;;  %vm3441_vm11 = vcmp.le.f32.partialorder %v1407_v26, 0.7853982  ;;  %v1493_v44 = vsub.s32 4, %v3386_v51  ;;  %v1836_v26 = vld [vmem:[%s3546_s3 + $0x68] sm:$0xff] }
 0x1f0   :  { %v2064_v25 = vpop.eup %2063  ;;  %vm1626_vm0 = vcmp.gt.s32.totalorder %v1625_v0, 0  ;;  %vm1776_vm1 = vc.u32 %v3428_v37, %v3430_v29  ;;  %v1777_v47 = vadd.s32 1, %v3431_v49  ;;  %v1774_v32 = vmul.u32 %v1767_v35, %v1758_v5 }
 0x1f1   :  { %v2066_v10 = vpop.eup %2065  ;;  %v1611_v28 = vxor.u32 2147483648, %v2064_v25  ;;  %v1482_v6 = vor.u32 %v1481_v9, %v1480_v40  ;;  %v1485_v39 = vshll.u32 %v1484_v23, 23  ;;  %v1627_v46 = vsel %vm1626_vm0, %v1625_v0, 0 }
 0x1f2   :  { %v1608_v20 = vxor.u32 2147483648, %v2066_v10  ;;  %vm1606_vm2 = vcmp.lt.s32.totalorder %v3396_v2, 2  ;;  %v1778_v15 = vsel %vm1776_vm1, %v1777_v47, %v3431_v49  ;;  %v1629_v56 = vand.u32 31, %v1627_v46 }
 0x1f3   :  { %v1612_v27 = vsel %vm1610_vm12, %v1611_v28, %v2066_v10  ;;  %v1486_v19 = vor.u32 4788187, %v1485_v39  ;;  %v1489_v43 = vcvt.s32.f32 %v1482_v6  ;;  %v1779_v53 = vadd.s32 %v1778_v15, %v1774_v32 }
 0x1f4   :  { %v1609_v21 = vsel %vm1607_vm15, %v2064_v25, %v1608_v20  ;;  %vm1409_vm3 = vcmp.lt.s32.totalorder %v3241_v12, 0  ;;  %v1622_v22 = vand.u32 8388607, %v1615_v14  ;;  %v1630_v30 = vsub.s32 32, %v1629_v56 }
 0x1f5   :  { %v1613_v18 = vsel %vm1606_vm2, %v1609_v21, %v1612_v27  ;;  %v1487_v60 = vand.u32 2147483647, %v1486_v19  ;;  %v1494_v2 = vsel %vm1409_vm3, %v1493_v44, %v3386_v51  ;;  %v1780_v42 = vadd.s32 536870912, %v1779_v53 }
 0x1f6   :  { %v1614_v35 = vsel %vm1603_vm14, nan, %v1613_v18  ;;  %v1632_v45 = vshll.u32 %v2084_v55, %v1629_v56  ;;  %v1633_v41 = vshrl.u32 %v2085_v59, %v1630_v30  ;;  %v1635_v34 = vshll.u32 %v2085_v59, %v1629_v56 }
 0x1f7   :  { %v1852_v58 = vadd.f32 %v1836_v26, %v1614_v35  ;;  %v1490_v36 = vmul.f32 %v1489_v43, %v1487_v60  ;;  %v1636_v57 = vshrl.u32 %v2086_v61, %v1630_v30  ;;  %v3472_v52 = vshrl.u32 %v1780_v42, 30 }
 0x1f8   :  { %v1639_v3 = vshrl.u32 %v2087_v63, %v1630_v30  ;;  %v1642_v51 = vshrl.u32 %v2088_v1, %v1630_v30  ;;  %v1496_v17 = vsel %vm3441_vm11, 0, %v1494_v2  ;;  %v1628_v54 = vshrl.u32 %v1627_v46, 5 }
 0x1f9   :  { %1869 = vst.msk [vmem:[%s3547_s4 + $0x68] sm:$0xff] %vm1855_vm13, %v1852_v58  ;;  %v1491_v38 = vxor.u32 2147483648, %v1490_v36  ;;  %v1638_v59 = vshll.u32 %v2086_v61, %v1629_v56  ;;  %v1641_v11 = vshll.u32 %v2087_v63, %v1629_v56  ;;  %v1782_v13 = vshll.u32 %v3472_v52, 30 }
 0x1fa   :  { %v1634_v7 = vor.u32 %v1633_v41, %v1632_v45  ;;  %v1637_v31 = vor.u32 %v1636_v57, %v1635_v34  ;;  %v1644_v49 = vshll.u32 %v2088_v1, %v1629_v56  ;;  %v1645_v40 = vshrl.u32 %v2089_v8, %v1630_v30  ;;  %v1835_v57 = vld [vmem:[%s3546_s3 + $0x60] sm:$0xff] }
 0x1fb   :  { %v1492_v4 = vsel %vm1409_vm3, %v1491_v38, %v1490_v36  ;;  %v1643_v33 = vor.u32 %v1642_v51, %v1641_v11  ;;  %v1783_v61 = vsub.s32 %v1779_v53, %v1782_v13  ;;  %v1640_v9 = vor.u32 %v1639_v3, %v1638_v59 }
 0x1fc   :  { %v1495_v24 = vsel %vm3441_vm11, %v3241_v12, %v1492_v4  ;;  %v1623_v63 = vor.u32 8388608, %v1622_v22  ;;  %v1646_v23 = vor.u32 %v1645_v40, %v1644_v49  ;;  %v1500_v0 = vadd.s32 3, %v1496_v17 }
 0x1fd   :  { %2067 = vcosq.f32 %v1495_v24  ;;  %v1785_v25 = vsub.s32 0, %v1783_v61  ;;  %vm1647_vm4 = vcmp.lt.s32.totalorder %v1628_v54, 1  ;;  %vm1650_vm5 = vcmp.lt.s32.totalorder %v1628_v54, 4 }
 0x1fe   :  { %2069 = vsinq.f32 %v1495_v24  ;;  %v1631_v5 = vshrl.u32 %v2084_v55, %v1630_v30  ;;  %vm1649_vm7 = vcmp.lt.s32.totalorder %v1628_v54, 3  ;;  %v1655_v10 = vsel %vm1647_vm4, %v1634_v7, %v1637_v31 }
 0x1ff   :  { %v1656_v28 = vsel %vm1650_vm5, %v1643_v33, 920167782  ;;  %v1939_v50 = vmin.u32 %v1785_v25, %v1783_v61  ;;  %vm1648_vm6 = vcmp.lt.s32.totalorder %v1628_v54, 2  ;;  %v1652_v1 = vsel %vm1650_vm5, %v1640_v9, 2102212464 }
 0x200   :  { %v1657_v8 = vsel %vm1649_vm7, %v1640_v9, %v1656_v28  ;;  %v1659_v39 = vsel %vm1647_vm4, %v1637_v31, %v1640_v9  ;;  %v1660_v20 = vsel %vm1650_vm5, %v1646_v23, 1326507024  ;;  %v1663_v44 = vshll.u32 %v1623_v63, 8 }
 0x201   :  { %v1658_v6 = vsel %vm1648_vm6, %v1655_v10, %v1657_v8  ;;  %v1501_v47 = vand.u32 3, %v1500_v0  ;;  %v1787_v27 = vclz %v1939_v50  ;;  %v1651_v19 = vsel %vm1647_vm4, %v1631_v5, %v1634_v7 }
 0x202   :  { %v1653_v32 = vsel %vm1649_vm7, %v1637_v31, %v1652_v1  ;;  %v1661_v55 = vsel %vm1649_vm7, %v1643_v33, %v1660_v20  ;;  %v3493_v46 = vmul.u32.u64.low %v1663_v44, %v1658_v6  ;;  %v3494_v26 = vmul.u32.u64.high %v1663_v44, %v1658_v6, %v3493_v46 }
 0x203   :  { %v1940_v21 = vadd.s32 4294967294, %v1787_v27  ;;  %v1662_v15 = vsel %vm1648_vm6, %v1659_v39, %v1661_v55  ;;  %vm1502_vm8 = vcmp.lt.s32.totalorder %v1501_v47, 2  ;;  %vm1503_vm9 = vcmp.eq.s32.totalorder %v1501_v47, 0 }
 0x204   :  { %v3497_v56 = vmul.u32.u64.low %v1663_v44, %v1662_v15  ;;  %v3498_v18 = vmul.u32.u64.high %v1663_v44, %v1662_v15, %v3497_v56  ;;  %v1654_v43 = vsel %vm1648_vm6, %v1651_v19, %v1653_v32  ;;  %vm1506_vm14 = vcmp.eq.s32.totalorder %v1501_v47, 2 }
 0x205   :  { %vm1941_vm10 = vcmp.lt.s32.totalorder %v1940_v21, 0  ;;  %v1673_v30 = vadd.s32 1, %v3494_v26  ;;  %v1775_v36 = vadd.s32 %v3430_v29, %v3428_v37  ;;  %v1670_v34 = vmul.u32 %v1663_v44, %v1654_v43 }
 0x206   :  { %v1790_v22 = vsel %vm1941_vm10, 0, %v1940_v21  ;;  %vm1672_vm15 = vc.u32 %v3498_v18, %v3493_v46  ;;  %vm1499_vm12 = vweird.f32 %v3241_v12  ;;  %v1805_v12 = vsub.s32 4, %v3472_v52 }
 0x207   :  { %v2068_v60 = vpop.eup %2067  ;;  %v1791_v2 = vsub.s32 32, %v1790_v22  ;;  %v1795_v42 = vsub.s32 4294967266, %v1790_v22  ;;  %v1792_v41 = vshll.u32 %v1783_v61, %v1790_v22  ;;  %v1674_v17 = vsel %vm1672_vm15, %v1673_v30, %v3494_v26 }
 0x208   :  { %v2070_v53 = vpop.eup %2069  ;;  %v1507_v35 = vxor.u32 2147483648, %v2068_v60  ;;  %v1675_v29 = vadd.s32 %v1674_v17, %v1670_v34  ;;  %vm1721_vm11 = vcmp.lt.s32.totalorder %v3335_v62, 0  ;;  %vm1720_vm0 = vcmp.le.f32.partialorder %v1719_v48, 0.7853982 }
 0x209   :  { %v1504_v58 = vxor.u32 2147483648, %v2070_v53  ;;  %v1793_v3 = vshrl.u32 %v1775_v36, %v1791_v2  ;;  %v1796_v51 = vadd.s32 127, %v1795_v42  ;;  %v1806_v0 = vsel %vm1721_vm11, %v1805_v12, %v3472_v52 }
 0x20a   :  { %v1508_v45 = vsel %vm1506_vm14, %v1507_v35, %v2070_v53  ;;  %v1676_v13 = vadd.s32 536870912, %v1675_v29  ;;  %v1808_v10 = vsel %vm1720_vm0, 0, %v1806_v0  ;;  %v1671_v6 = vadd.s32 %v3493_v46, %v3498_v18  ;;  %v1838_v46 = vld [vmem:[%s3546_s3 + $0x78] sm:$0xff] }
 0x20b   :  { %v1505_v38 = vsel %vm1503_vm9, %v2068_v60, %v1504_v58  ;;  %v1794_v59 = vor.u32 %v1793_v3, %v1792_v41  ;;  %v1797_v11 = vshll.u32 %v1796_v51, 23  ;;  %v1812_v1 = vadd.s32 3, %v1808_v10 }
 0x20c   :  { %v1509_v37 = vsel %vm1502_vm8, %v1505_v38, %v1508_v45  ;;  %v1677_v31 = vshrl.u32 %v1676_v13, 30  ;;  %vm1811_vm5 = vweird.f32 %v3335_v62  ;;  %vm1617_vm7 = vcmp.lt.s32.totalorder %v3389_v16, 0 }
 0x20d   :  { %v1510_v54 = vsel %vm1499_vm12, nan, %v1509_v37  ;;  %v1798_v7 = vor.u32 4788187, %v1797_v11  ;;  %v1801_v33 = vcvt.s32.f32 %v1794_v59  ;;  %v1813_v44 = vand.u32 3, %v1812_v1 }
 0x20e   :  { %v1851_v4 = vadd.f32 %v1835_v57, %v1510_v54  ;;  %v1678_v49 = vshll.u32 %v1677_v31, 30  ;;  %v1701_v58 = vsub.s32 4, %v1677_v31  ;;  %vm1616_vm6 = vcmp.le.f32.partialorder %v1615_v14, 0.7853982  ;;  %v1837_v14 = vld [vmem:[%s3546_s3 + $0x70] sm:$0xff] }
 0x20f   :  { %v1799_v24 = vand.u32 2147483647, %v1798_v7  ;;  %vm1818_vm2 = vcmp.eq.s32.totalorder %v1813_v44, 2  ;;  %vm1815_vm3 = vcmp.eq.s32.totalorder %v1813_v44, 0  ;;  %vm1814_vm4 = vcmp.lt.s32.totalorder %v1813_v44, 2 }
 0x210   :  { %1868 = vst.msk [vmem:[%s3547_s4 + $0x60] sm:$0xff] %vm1855_vm13, %v1851_v4  ;;  %v1679_v61 = vsub.s32 %v1675_v29, %v1678_v49  ;;  %vm1707_vm14 = vweird.f32 %v3389_v16 }
 0x211   :  { %v1802_v40 = vmul.f32 %v1801_v33, %v1799_v24 }
 0x212   :  { %v1681_v63 = vsub.s32 0, %v1679_v61 }
 0x213   :  { %v1803_v9 = vxor.u32 2147483648, %v1802_v40 }
 0x214   :  { %v1935_v5 = vmin.u32 %v1681_v63, %v1679_v61 }
 0x215   :  { %v1804_v23 = vsel %vm1721_vm11, %v1803_v9, %v1802_v40 }
 0x216   :  { %v1807_v25 = vsel %vm1720_vm0, %v3335_v62, %v1804_v23  ;;  %v1683_v28 = vclz %v1935_v5  ;;  %v1702_v62 = vsel %vm1617_vm7, %v1701_v58, %v1677_v31 }
 0x217   :  { %2071 = vcosq.f32 %v1807_v25  ;;  %v1704_v45 = vsel %vm1616_vm6, 0, %v1702_v62 }
 0x218   :  { %2073 = vsinq.f32 %v1807_v25  ;;  %v1936_v50 = vadd.s32 4294967294, %v1683_v28  ;;  %v1708_v41 = vadd.s32 3, %v1704_v45 }
 0x21a   :  { %vm1937_vm1 = vcmp.lt.s32.totalorder %v1936_v50, 0  ;;  %v1709_v34 = vand.u32 3, %v1708_v41 }
 0x21b   :  { %v1686_v8 = vsel %vm1937_vm1, 0, %v1936_v50 }
 0x21c   :  { %v1687_v39 = vsub.s32 32, %v1686_v8  ;;  %v1691_v20 = vsub.s32 4294967266, %v1686_v8  ;;  %v1688_v48 = vshll.u32 %v1679_v61, %v1686_v8  ;;  %vm1714_vm8 = vcmp.eq.s32.totalorder %v1709_v34, 2 }
 0x21d   :  { %vm1711_vm9 = vcmp.eq.s32.totalorder %v1709_v34, 0  ;;  %vm1710_vm10 = vcmp.lt.s32.totalorder %v1709_v34, 2 }
 0x21e   :  { %v1689_v47 = vshrl.u32 %v1671_v6, %v1687_v39  ;;  %v1692_v27 = vadd.s32 127, %v1691_v20 }
 0x220   :  { %v1690_v55 = vor.u32 %v1689_v47, %v1688_v48  ;;  %v1693_v26 = vshll.u32 %v1692_v27, 23 }
 0x221   :  { %v2072_v52 = vpop.eup %2071 }
 0x222   :  { %v2074_v19 = vpop.eup %2073  ;;  %v1819_v32 = vxor.u32 2147483648, %v2072_v52  ;;  %v1694_v56 = vor.u32 4788187, %v1693_v26  ;;  %v1697_v53 = vcvt.s32.f32 %v1690_v55 }
 0x223   :  { %v1816_v21 = vxor.u32 2147483648, %v2074_v19 }
 0x224   :  { %v1820_v15 = vsel %vm1818_vm2, %v1819_v32, %v2074_v19  ;;  %v1695_v43 = vand.u32 2147483647, %v1694_v56 }
 0x225   :  { %v1817_v18 = vsel %vm1815_vm3, %v2072_v52, %v1816_v21 }
 0x226   :  { %v1821_v60 = vsel %vm1814_vm4, %v1817_v18, %v1820_v15  ;;  %v1698_v30 = vmul.f32 %v1697_v53, %v1695_v43 }
 0x227   :  { %v1822_v35 = vsel %vm1811_vm5, nan, %v1821_v60 }
 0x228   :  { %v1854_v22 = vadd.f32 %v1838_v46, %v1822_v35  ;;  %v1699_v36 = vxor.u32 2147483648, %v1698_v30 }
 0x22a   :  { %1871 = vst.msk [vmem:[%s3547_s4 + $0x78] sm:$0xff] %vm1855_vm13, %v1854_v22  ;;  %v1700_v2 = vsel %vm1617_vm7, %v1699_v36, %v1698_v30 }
 0x22b   :  { %v1703_v42 = vsel %vm1616_vm6, %v3389_v16, %v1700_v2 }
 0x22c   :  { %2075 = vcosq.f32 %v1703_v42 }
 0x22d   :  { %2077 = vsinq.f32 %v1703_v42 }
 0x236   :  { %v2076_v57 = vpop.eup %2075 }
 0x237   :  { %v2078_v38 = vpop.eup %2077  ;;  %v1715_v3 = vxor.u32 2147483648, %v2076_v57 }
 0x238   :  { %v1712_v51 = vxor.u32 2147483648, %v2078_v38 }
 0x239   :  { %v1716_v17 = vsel %vm1714_vm8, %v1715_v3, %v2078_v38 }
 0x23a   :  { %v1713_v37 = vsel %vm1711_vm9, %v2076_v57, %v1712_v51 }
 0x23b   :  { %v1717_v29 = vsel %vm1710_vm10, %v1713_v37, %v1716_v17 }
 0x23c   :  { %v1718_v54 = vsel %vm1707_vm14, nan, %v1717_v29 }
 0x23d   :  { %v1853_v59 = vadd.f32 %v1837_v14, %v1718_v54 }
 0x23f   :  { %1870 = vst.msk [vmem:[%s3547_s4 + $0x70] sm:$0xff] %vm1855_vm13, %v1853_v59 }

</bundles_post_ra>
